<compile_context>
chip_gen: v5e
topology: v5e:2x2
jax: 0.10.0
libtpu: 0.0.40
codegen_flags: <defaults>
</compile_context>

<pallas_src>
import jax
import jax.numpy as jnp
from jax import lax
from jax.experimental import pallas as pl
from jax.experimental.pallas import tpu as pltpu

H, W = 32, 16
HW = H * W              # 512 -> lane-dense (4 x 128)


def _round_up(x, m):
    return ((x + m - 1) // m) * m


def _net_kernel(org_ref,    # (TB, 512) VMEM f32
                pre_ref,    # (TB, 512) VMEM f32
                qp_ref,     # (TB, 1)   VMEM f32
                wconv_ref,  # (512, 512) VMEM bf16  NC1 conv matrix (masks folded in)
                w2s_ref,    # (2, 512, 16) VMEM f32 NC2 weights for [T, pre] channels
                w3_ref,     # (16, 18)  VMEM f32    NC3_1 | NC3_2 fused
                wfc_ref,    # (18, 4)   VMEM f32    block-diag FC1 (both heads)
                misc_ref,   # (8, 512)  VMEM f32    bias / qp-weight rows
                out_ref):   # (TB, 4)   VMEM f32    [x1_0, x1_1, x2_0, x2_1]
    misc = misc_ref[...]                              # (8, 512), tiny

    # ---- NC1: 3x3 conv (pad 1) as one bf16 MXU matmul, f32 accumulation, + ReLU ----
    t = jnp.dot(org_ref[...].astype(jnp.bfloat16), wconv_ref[...],
                preferred_element_type=jnp.float32)   # (TB, 512)
    t = jnp.maximum(t + misc[0:1, :], 0.0)            # + b1, ReLU

    # ---- NC2: (16,8) kernel / (16,8) stride conv on cat(T, pre) + ReLU -> (TB, 16) ----
    # Column index = patch*4 + out_ch (patch = (h//16)*2 + (w//8)).
    z = (jnp.dot(t, w2s_ref[0], preferred_element_type=jnp.float32)
         + jnp.dot(pre_ref[...], w2s_ref[1], preferred_element_type=jnp.float32)
         + misc[1:2, 0:16])
    r = jnp.maximum(z, 0.0)                           # (TB, 16)

    # ---- NC3_1 & NC3_2 (2x2 / stride 2) fused into one matmul + ReLU -> (TB, 18) ----
    t3 = jnp.maximum(jnp.dot(r, w3_ref[...], preferred_element_type=jnp.float32)
                     + misc[2:3, 0:18], 0.0)

    # ---- FC1 for both heads (block-diagonal) + qp column + bias -> (TB, 4) ----
    qpn = qp_ref[...] * (1.0 / 64.0) - 0.5            # (TB, 1)
    out_ref[...] = (jnp.dot(t3, wfc_ref[...], preferred_element_type=jnp.float32)
                    + qpn * misc[3:4, 0:4] + misc[4:5, 0:4])


def _prep_weights(params):
    """Parameter re-layout only (no activation compute)."""
    f32 = jnp.float32
    o = jnp.arange(HW)
    oh, ow = o // W, o % W

    # NC1: dense (512, 512) conv matrix; Wconv[in_flat, out_flat] = w1 tap, with
    # out-of-image / horizontally-wrapped taps zeroed.  bf16 for the MXU.
    w1 = params["w1"].astype(f32)[0, 0]               # (3, 3)
    wconv = jnp.zeros((HW, HW), f32)
    for kh in range(3):
        for kw in range(3):
            dh, dw = kh - 1, kw - 1
            valid = ((oh + dh >= 0) & (oh + dh < H) &
                     (ow + dw >= 0) & (ow + dw < W))
            src = jnp.clip(o + dh * W + dw, 0, HW - 1)
            wconv = wconv.at[src, o].add(jnp.where(valid, w1[kh, kw], 0.0))
    wconv_bf16 = wconv.astype(jnp.bfloat16)

    # NC2: block-sparse (512, 16) weights per input channel; column = patch*4 + out_ch.
    hh = jnp.arange(H)[:, None]                       # (32, 1)
    ww = jnp.arange(W)[None, :]                       # (1, 16)
    w2 = params["w2"].astype(f32)                     # (4, 2, 16, 8)
    patch = (hh // 16) * 2 + (ww // 8)                # (32, 16) in {0..3}
    onehot = (patch[None, :, :] == jnp.arange(4)[:, None, None]).astype(f32)  # (4,32,16)

    def _w2big(ch):
        wt = w2[:, ch][:, hh % 16, ww % 8]            # (4, 32, 16) tiled weights
        m = onehot[:, None, :, :] * wt[None, :, :, :]  # (patch, out, 32, 16)
        return m.reshape(16, HW).T                    # (512, 16)

    w2s = jnp.stack([_w2big(0), _w2big(1)])           # (2, 512, 16)

    # NC3: (16, 9) per head, row index = (kh*2+kw)*4 + in_ch; fuse both heads -> (16,18).
    def _w3mat(w3):
        return jnp.transpose(w3.astype(f32), (2, 3, 1, 0)).reshape(16, 9)

    w3 = jnp.concatenate([_w3mat(params["w3_1"]), _w3mat(params["w3_2"])], axis=1)

    # FC1 used for BOTH heads (matches the PyTorch forward): block-diagonal (18, 4).
    fcw9t = params["fc1_w"].astype(f32)[:, :9].T      # (9, 2)
    wfc = jnp.zeros((18, 4), f32).at[:9, :2].set(fcw9t).at[9:, 2:].set(fcw9t)

    # Misc slab: row0=b1(512), row1[:16]=b2 tiled, row2[:18]=b3_1|b3_2,
    # row3[:4]=FC1 qp-column weights (x2), row4[:4]=FC1 bias (x2).
    misc = jnp.zeros((8, HW), f32)
    misc = misc.at[0, :].set(jnp.broadcast_to(params["b1"].astype(f32), (HW,)))
    misc = misc.at[1, :16].set(jnp.tile(params["b2"].astype(f32), 4))
    misc = misc.at[2, :18].set(
        jnp.concatenate([params["b3_1"], params["b3_2"]]).astype(f32))
    misc = misc.at[3, :4].set(jnp.tile(params["fc1_w"].astype(f32)[:, 9], 2))
    misc = misc.at[4, :4].set(jnp.tile(params["fc1_b"].astype(f32), 2))

    return wconv_bf16, w2s, w3, wfc, misc


def net32x16_forward(params, org, pre, qp):
    """org, pre: (B, 1, 32, 16) NCHW float32; qp: (B, 1). Returns (x1, x2), each (B, 2)."""
    B = org.shape[0]
    org_flat = org.reshape(B, HW).astype(jnp.float32)   # lane-dense, no halo pad
    pre_flat = pre.reshape(B, HW).astype(jnp.float32)
    qp32 = qp.reshape(B, 1).astype(jnp.float32)

    wconv, w2s, w3, wfc, misc = _prep_weights(params)

    # Batch tiling: TB multiple of 8 (or == B when B <= 8), TB <= min(B, 1024),
    # and >= 2 grid steps whenever B >= 16 so both v7x TensorCores get work.
    # TB <= B means no wrapper-side batch padding; at most the last block is ragged
    # (Pallas masks its output store; garbage rows never mix into real rows).
    if B <= 8:
        TB = B
    else:
        nb0 = max(2, pl.cdiv(B, 1024))
        TB = min(_round_up(pl.cdiv(B, nb0), 8), (B // 8) * 8)
    nb = pl.cdiv(B, TB)

    flops = B * 2 * (HW * HW + 2 * HW * 16 + 16 * 18 + 18 * 4)
    bytes_accessed = (4 * B * (HW + HW + 1 + 4)        # org, pre, qp, out
                      + 2 * HW * HW                    # bf16 conv matrix
                      + 4 * (2 * HW * 16 + 16 * 18 + 18 * 4 + 8 * HW))

    out = pl.pallas_call(
        _net_kernel,
        out_shape=jax.ShapeDtypeStruct((B, 4), jnp.float32),
        grid=(nb,),
        in_specs=[
            pl.BlockSpec((TB, HW), lambda i: (i, 0)),       # org
            pl.BlockSpec((TB, HW), lambda i: (i, 0)),       # pre
            pl.BlockSpec((TB, 1), lambda i: (i, 0)),        # qp
            pl.BlockSpec((HW, HW), lambda i: (0, 0)),       # wconv (bf16)
            pl.BlockSpec((2, HW, 16), lambda i: (0, 0, 0)),  # w2s
            pl.BlockSpec((16, 18), lambda i: (0, 0)),       # w3 (fused heads)
            pl.BlockSpec((18, 4), lambda i: (0, 0)),        # wfc (block-diag FC1)
            pl.BlockSpec((8, HW), lambda i: (0, 0)),        # misc biases/qp rows
        ],
        out_specs=pl.BlockSpec((TB, 4), lambda i: (i, 0)),
        compiler_params=pltpu.CompilerParams(
            dimension_semantics=("parallel",),
            vmem_limit_bytes=32 * 1024 * 1024),
        cost_estimate=pl.CostEstimate(
            flops=flops, transcendentals=0, bytes_accessed=bytes_accessed),
    )(org_flat, pre_flat, qp32, wconv, w2s, w3, wfc, misc)

    return out[:, :2], out[:, 2:4]


def net32x16_reference(params, org, pre, qp):
    """Pure-JAX (lax.conv) reference mirroring the PyTorch forward exactly (all f32)."""
    hi = lax.Precision.HIGHEST

    def conv(x, w, stride, padding):
        return lax.conv_general_dilated(
            x, w, window_strides=stride, padding=padding,
            dimension_numbers=("NCHW", "OIHW", "NCHW"), precision=hi)

    t = jax.nn.relu(conv(org, params["w1"], (1, 1), ((1, 1), (1, 1)))
                    + params["b1"][None, :, None, None])
    cat = jnp.concatenate([t, pre], axis=1)
    t = jax.nn.relu(conv(cat, params["w2"], (16, 8), "VALID")
                    + params["b2"][None, :, None, None])
    t1 = jax.nn.relu(conv(t, params["w3_1"], (2, 2), "VALID")
                     + params["b3_1"][None, :, None, None])[:, :, 0, 0]
    t2 = jax.nn.relu(conv(t, params["w3_2"], (2, 2), "VALID")
                     + params["b3_2"][None, :, None, None])[:, :, 0, 0]
    qpn = qp / 64.0 - 0.5
    f1 = jnp.concatenate([t1, qpn], axis=1)
    f2 = jnp.concatenate([t2, qpn], axis=1)
    x1 = jnp.dot(f1, params["fc1_w"].T, precision=hi) + params["fc1_b"]
    x2 = jnp.dot(f2, params["fc1_w"].T, precision=hi) + params["fc1_b"]  # FC1 for both, as in PyTorch
    return x1, x2


def init_params(key):
    ks = jax.random.split(key, 12)
    n = lambda k, s, sc: sc * jax.random.normal(k, s, jnp.float32)
    return dict(
        w1=n(ks[0], (1, 1, 3, 3), 0.3),   b1=n(ks[1], (1,), 0.1),
        w2=n(ks[2], (4, 2, 16, 8), 0.08), b2=n(ks[3], (4,), 0.1),
        w3_1=n(ks[4], (9, 4, 2, 2), 0.3), b3_1=n(ks[5], (9,), 0.1),
        w3_2=n(ks[6], (9, 4, 2, 2), 0.3), b3_2=n(ks[7], (9,), 0.1),
        fc1_w=n(ks[8], (2, 10), 0.3),     fc1_b=n(ks[9], (2,), 0.1),
        # FC2 exists in the PyTorch module but is never used in forward().
        fc2_w=n(ks[10], (2, 10), 0.3),    fc2_b=n(ks[11], (2,), 0.1),
    )


if __name__ == "__main__":
    root = jax.random.PRNGKey(0)
    kp, kin = jax.random.split(root)
    params = init_params(kp)

    B = 2
    k1, k2, k3 = jax.random.split(kin, 3)
    org = jax.random.normal(k1, (B, 1, H, W), jnp.float32)
    pre = jax.random.normal(k2, (B, 1, H, W), jnp.float32)
    qp = jax.random.uniform(k3, (B, 1), jnp.float32, 0.0, 64.0)

    x1, x2 = jax.jit(net32x16_forward)(params, org, pre, qp)
    jax.block_until_ready((x1, x2))

    r1, r2 = net32x16_reference(params, org, pre, qp)
    assert x1.shape == (B, 2) and x2.shape == (B, 2)
    # Tolerance accounts for the intentional bf16 MXU cast of the NC1 conv (inputs and
    # conv matrix rounded to bf16, f32 accumulation) vs. the all-f32 HIGHEST reference;
    # expected error is ~1e-3-5e-3, so 2e-2 leaves comfortable margin.
    assert jnp.allclose(x1, r1, atol=2e-2, rtol=2e-2), (x1, r1)
    assert jnp.allclose(x2, r2, atol=2e-2, rtol=2e-2), (x2, r2)
    print("KERNEL_OK")
</pallas_src>

<mosaic_0001>
module attributes {stable_mosaic.version = 11 : i64} {
  func.func @_net_kernel(%arg0: i32, %arg1: memref<2x512xf32, #tpu.memory_space<vmem>>, %arg2: memref<2x512xf32, #tpu.memory_space<vmem>>, %arg3: memref<2x1xf32, #tpu.memory_space<vmem>>, %arg4: memref<512x512xbf16, #tpu.memory_space<vmem>>, %arg5: memref<2x512x16xf32, #tpu.memory_space<vmem>>, %arg6: memref<16x18xf32, #tpu.memory_space<vmem>>, %arg7: memref<18x4xf32, #tpu.memory_space<vmem>>, %arg8: memref<8x512xf32, #tpu.memory_space<vmem>>, %arg9: memref<2x4xf32, #tpu.memory_space<vmem>>) attributes {dimension_semantics = [#tpu.dimension_semantics<parallel>], iteration_bounds = array<i64: 1>, scalar_prefetch = 0 : i64, scratch_operands = 0 : i64, tpu.core_type = #tpu.core_type<tc>, window_params = [{transform_indices = @transform_0, window_bounds = array<i64: 2, 512>}, {transform_indices = @transform_1, window_bounds = array<i64: 2, 512>}, {transform_indices = @transform_2, window_bounds = array<i64: 2, 1>}, {pipeline_mode = #tpu.pipeline_mode<synchronous>, transform_indices = @transform_3, window_bounds = array<i64: 512, 512>}, {pipeline_mode = #tpu.pipeline_mode<synchronous>, transform_indices = @transform_4, window_bounds = array<i64: 2, 512, 16>}, {pipeline_mode = #tpu.pipeline_mode<synchronous>, transform_indices = @transform_5, window_bounds = array<i64: 16, 18>}, {pipeline_mode = #tpu.pipeline_mode<synchronous>, transform_indices = @transform_6, window_bounds = array<i64: 18, 4>}, {pipeline_mode = #tpu.pipeline_mode<synchronous>, transform_indices = @transform_7, window_bounds = array<i64: 8, 512>}, {transform_indices = @transform_8, window_bounds = array<i64: 2, 4>}]} {
    %c0 = arith.constant 0 : index
    %c0_0 = arith.constant 0 : index
    %0 = vector.load %arg8[%c0, %c0_0] : memref<8x512xf32, #tpu.memory_space<vmem>>, vector<8x512xf32>
    %c0_1 = arith.constant 0 : index
    %c0_2 = arith.constant 0 : index
    %1 = vector.load %arg1[%c0_1, %c0_2] : memref<2x512xf32, #tpu.memory_space<vmem>>, vector<2x512xf32>
    %2 = arith.truncf %1 : vector<2x512xf32> to vector<2x512xbf16>
    %c0_3 = arith.constant 0 : index
    %c0_4 = arith.constant 0 : index
    %3 = vector.load %arg4[%c0_3, %c0_4] : memref<512x512xbf16, #tpu.memory_space<vmem>>, vector<512x512xbf16>
    %cst = arith.constant dense<0.000000e+00> : vector<2x512xf32>
    %4 = tpu.matmul %2, %3, %cst {dimension_numbers = #tpu.dot_dimension_numbers<[1], [0], [0], [1], [0, 0, 1, 1], [], []>} : vector<2x512xbf16>, vector<512x512xbf16>, vector<2x512xf32> -> vector<2x512xf32>
    %5 = vector.extract_strided_slice %0 {offsets = [0, 0], sizes = [1, 512], strides = [1, 1]} : vector<8x512xf32> to vector<1x512xf32>
    %6 = vector.broadcast %5 : vector<1x512xf32> to vector<2x512xf32>
    %7 = arith.addf %4, %6 : vector<2x512xf32>
    %cst_5 = arith.constant 0.000000e+00 : f32
    %8 = vector.broadcast %cst_5 : f32 to vector<2x512xf32>
    %9 = arith.maximumf %7, %8 : vector<2x512xf32>
    %c0_6 = arith.constant 0 : index
    %c0_7 = arith.constant 0 : index
    %c0_8 = arith.constant 0 : index
    %10 = vector.load %arg5[%c0_6, %c0_7, %c0_8] : memref<2x512x16xf32, #tpu.memory_space<vmem>>, vector<1x512x16xf32>
    %11 = vector.shape_cast %10 : vector<1x512x16xf32> to vector<512x16xf32>
    %cst_9 = arith.constant dense<0.000000e+00> : vector<2x16xf32>
    %12 = tpu.matmul %9, %11, %cst_9 {dimension_numbers = #tpu.dot_dimension_numbers<[1], [0], [0], [1], [0, 0, 1, 1], [], []>} : vector<2x512xf32>, vector<512x16xf32>, vector<2x16xf32> -> vector<2x16xf32>
    %c0_10 = arith.constant 0 : index
    %c0_11 = arith.constant 0 : index
    %13 = vector.load %arg2[%c0_10, %c0_11] : memref<2x512xf32, #tpu.memory_space<vmem>>, vector<2x512xf32>
    %c1 = arith.constant 1 : index
    %c0_12 = arith.constant 0 : index
    %c0_13 = arith.constant 0 : index
    %14 = vector.load %arg5[%c1, %c0_12, %c0_13] : memref<2x512x16xf32, #tpu.memory_space<vmem>>, vector<1x512x16xf32>
    %15 = vector.shape_cast %14 : vector<1x512x16xf32> to vector<512x16xf32>
    %cst_14 = arith.constant dense<0.000000e+00> : vector<2x16xf32>
    %16 = tpu.matmul %13, %15, %cst_14 {dimension_numbers = #tpu.dot_dimension_numbers<[1], [0], [0], [1], [0, 0, 1, 1], [], []>} : vector<2x512xf32>, vector<512x16xf32>, vector<2x16xf32> -> vector<2x16xf32>
    %17 = arith.addf %12, %16 : vector<2x16xf32>
    %18 = vector.extract_strided_slice %0 {offsets = [1, 0], sizes = [1, 16], strides = [1, 1]} : vector<8x512xf32> to vector<1x16xf32>
    %19 = vector.broadcast %18 : vector<1x16xf32> to vector<2x16xf32>
    %20 = arith.addf %17, %19 : vector<2x16xf32>
    %cst_15 = arith.constant 0.000000e+00 : f32
    %21 = vector.broadcast %cst_15 : f32 to vector<2x16xf32>
    %22 = arith.maximumf %20, %21 : vector<2x16xf32>
    %c0_16 = arith.constant 0 : index
    %c0_17 = arith.constant 0 : index
    %23 = vector.load %arg6[%c0_16, %c0_17] : memref<16x18xf32, #tpu.memory_space<vmem>>, vector<16x18xf32>
    %cst_18 = arith.constant dense<0.000000e+00> : vector<2x18xf32>
    %24 = tpu.matmul %22, %23, %cst_18 {dimension_numbers = #tpu.dot_dimension_numbers<[1], [0], [0], [1], [0, 0, 1, 1], [], []>} : vector<2x16xf32>, vector<16x18xf32>, vector<2x18xf32> -> vector<2x18xf32>
    %25 = vector.extract_strided_slice %0 {offsets = [2, 0], sizes = [1, 18], strides = [1, 1]} : vector<8x512xf32> to vector<1x18xf32>
    %26 = vector.broadcast %25 : vector<1x18xf32> to vector<2x18xf32>
    %27 = arith.addf %24, %26 : vector<2x18xf32>
    %cst_19 = arith.constant 0.000000e+00 : f32
    %28 = vector.broadcast %cst_19 : f32 to vector<2x18xf32>
    %29 = arith.maximumf %27, %28 : vector<2x18xf32>
    %c0_20 = arith.constant 0 : index
    %c0_21 = arith.constant 0 : index
    %30 = vector.load %arg3[%c0_20, %c0_21] : memref<2x1xf32, #tpu.memory_space<vmem>>, vector<2x1xf32>
    %cst_22 = arith.constant 1.562500e-02 : f32
    %31 = vector.broadcast %cst_22 : f32 to vector<2x1xf32>
    %32 = arith.mulf %30, %31 : vector<2x1xf32>
    %cst_23 = arith.constant 5.000000e-01 : f32
    %33 = vector.broadcast %cst_23 : f32 to vector<2x1xf32>
    %34 = arith.subf %32, %33 : vector<2x1xf32>
    %c0_24 = arith.constant 0 : index
    %c0_25 = arith.constant 0 : index
    %35 = vector.load %arg7[%c0_24, %c0_25] : memref<18x4xf32, #tpu.memory_space<vmem>>, vector<18x4xf32>
    %cst_26 = arith.constant dense<0.000000e+00> : vector<2x4xf32>
    %36 = tpu.matmul %29, %35, %cst_26 {dimension_numbers = #tpu.dot_dimension_numbers<[1], [0], [0], [1], [0, 0, 1, 1], [], []>} : vector<2x18xf32>, vector<18x4xf32>, vector<2x4xf32> -> vector<2x4xf32>
    %37 = vector.extract_strided_slice %0 {offsets = [3, 0], sizes = [1, 4], strides = [1, 1]} : vector<8x512xf32> to vector<1x4xf32>
    %38 = vector.broadcast %34 : vector<2x1xf32> to vector<2x4xf32>
    %39 = vector.broadcast %37 : vector<1x4xf32> to vector<2x4xf32>
    %40 = arith.mulf %38, %39 : vector<2x4xf32>
    %41 = arith.addf %36, %40 : vector<2x4xf32>
    %42 = vector.extract_strided_slice %0 {offsets = [4, 0], sizes = [1, 4], strides = [1, 1]} : vector<8x512xf32> to vector<1x4xf32>
    %43 = vector.broadcast %42 : vector<1x4xf32> to vector<2x4xf32>
    %44 = arith.addf %41, %43 : vector<2x4xf32>
    %c0_27 = arith.constant 0 : index
    %c0_28 = arith.constant 0 : index
    %45 = vector.load %arg9[%c0_27, %c0_28] : memref<2x4xf32, #tpu.memory_space<vmem>>, vector<2x4xf32>
    tpu.vector_store %arg9[%c0_27, %c0_28], %44 {strides = array<i32>} : memref<2x4xf32, #tpu.memory_space<vmem>>, vector<2x4xf32>,
    return
  }
  func.func @transform_0(%arg0: i32) -> (i32, i32) {
    %c0_i32 = arith.constant 0 : i32
    %c0_i32_0 = arith.constant 0 : i32
    return %arg0, %c0_i32 : i32, i32
  }
  func.func @transform_1(%arg0: i32) -> (i32, i32) {
    %c0_i32 = arith.constant 0 : i32
    %c0_i32_0 = arith.constant 0 : i32
    return %arg0, %c0_i32 : i32, i32
  }
  func.func @transform_2(%arg0: i32) -> (i32, i32) {
    %c0_i32 = arith.constant 0 : i32
    %c0_i32_0 = arith.constant 0 : i32
    return %arg0, %c0_i32 : i32, i32
  }
  func.func @transform_3(%arg0: i32) -> (i32, i32) {
    %c0_i32 = arith.constant 0 : i32
    %c0_i32_0 = arith.constant 0 : i32
    %c0_i32_1 = arith.constant 0 : i32
    return %c0_i32, %c0_i32_0 : i32, i32
  }
  func.func @transform_4(%arg0: i32) -> (i32, i32, i32) {
    %c0_i32 = arith.constant 0 : i32
    %c0_i32_0 = arith.constant 0 : i32
    %c0_i32_1 = arith.constant 0 : i32
    %c0_i32_2 = arith.constant 0 : i32
    return %c0_i32, %c0_i32_0, %c0_i32_1 : i32, i32, i32
  }
  func.func @transform_5(%arg0: i32) -> (i32, i32) {
    %c0_i32 = arith.constant 0 : i32
    %c0_i32_0 = arith.constant 0 : i32
    %c0_i32_1 = arith.constant 0 : i32
    return %c0_i32, %c0_i32_0 : i32, i32
  }
  func.func @transform_6(%arg0: i32) -> (i32, i32) {
    %c0_i32 = arith.constant 0 : i32
    %c0_i32_0 = arith.constant 0 : i32
    %c0_i32_1 = arith.constant 0 : i32
    return %c0_i32, %c0_i32_0 : i32, i32
  }
  func.func @transform_7(%arg0: i32) -> (i32, i32) {
    %c0_i32 = arith.constant 0 : i32
    %c0_i32_0 = arith.constant 0 : i32
    %c0_i32_1 = arith.constant 0 : i32
    return %c0_i32, %c0_i32_0 : i32, i32
  }
  func.func @transform_8(%arg0: i32) -> (i32, i32) {
    %c0_i32 = arith.constant 0 : i32
    %c0_i32_0 = arith.constant 0 : i32
    return %arg0, %c0_i32 : i32, i32
  }
}

</mosaic_0001>

<bundles_post_ra>
// kernel: tile.17
= control target key start
LH: loop header
LB: loop body
LE: loop exit
PB: predicated region body
PF: predicated region fallthrough
CT: control target
= control target key end

     0   :  { %s22_s0 = inlined_call_operand.vmem [shape: f32[4], index: 0, kind: input, shape index: {}]   ;;  %s23_s1 = inlined_call_operand.vmem [shape: f32[4,4], index: 1, kind: output, shape index: {}]  }
   0x1   :  { %v4_v0 = vld [vmem:[%s22_s0] ss:$0 sm:$0xff] }
   0x2   :  { %5 = vst [vmem:[%s23_s1] sm:$0xf] %v4_v0 }

// kernel: tile.21
= control target key start
LH: loop header
LB: loop body
LE: loop exit
PB: predicated region body
PF: predicated region fallthrough
CT: control target
= control target key end

     0   :  { %s22_s0 = inlined_call_operand.vmem [shape: f32[2], index: 0, kind: input, shape index: {}]   ;;  %s23_s1 = inlined_call_operand.vmem [shape: f32[2,2], index: 1, kind: output, shape index: {}]  }
   0x1   :  { %v4_v0 = vld [vmem:[%s22_s0] ss:$0 sm:$0xff] }
   0x2   :  { %5 = vst [vmem:[%s23_s1] sm:$0x3] %v4_v0 }

// kernel: net32x16_forward.1
= control target key start
LH: loop header
LB: loop body
LE: loop exit
PB: predicated region body
PF: predicated region fallthrough
CT: control target
= control target key end

     0   :  { %vm1380_vm0 = vcmask 1041408   ;;  %vm1338_vm1 = vcmask 130048   ;;  %vm1376_vm2 = vcmask 146432   ;;  %vm1406_vm3 = vcmask 25600   ;;  %s3390_s3 = inlined_call_operand.vmem [shape: bf16[512,512], index: 3, kind: input, shape index: {}]   ;;  %s3391_s0 = inlined_call_operand.vmem [shape: f32[2,512], index: 0, kind: input, shape index: {}]   ;;  %s3392_s1 = inlined_call_operand.vmem [shape: f32[2,512], index: 1, kind: input, shape index: {}]   ;;  %s3393_s4 = inlined_call_operand.vmem [shape: f32[2,512,16], index: 4, kind: input, shape index: {}]   ;;  %s3394_s7 = inlined_call_operand.vmem [shape: f32[8,512], index: 7, kind: input, shape index: {}]   ;;  %s3395_s5 = inlined_call_operand.vmem [shape: f32[16,18], index: 5, kind: input, shape index: {}]   ;;  %s3396_s6 = inlined_call_operand.vmem [shape: f32[18,4], index: 6, kind: input, shape index: {}]   ;;  %s3397_s2 = inlined_call_operand.vmem [shape: f32[2,1], index: 2, kind: input, shape index: {}]   ;;  %s3398_s8 = inlined_call_operand.vmem [shape: f32[2,4], index: 8, kind: output, shape index: {}]  }
   0x1   :  { %v1526_v0 = vld [vmem:[%s3390_s3 + $0xe0] sm:$0xf]  ;;  %v2022_v1 = vld [vmem:[%s3390_s3 + $0xec] sm:$0xf0] }
   0x2   :  { %v1654_v2 = vld [vmem:[%s3390_s3 + $0x1e0] sm:$0xf]  ;;  %v1527_v3 = vor.u32 %v2022_v1, %v1526_v0  ;;  %v2054_v4 = vld [vmem:[%s3390_s3 + $0x1ec] sm:$0xf0] }
   0x3   :  { %v1782_v5 = vld [vmem:[%s3390_s3 + $0x2e0] sm:$0xf]  ;;  %v2086_v6 = vld [vmem:[%s3390_s3 + $0x2ec] sm:$0xf0]  ;;  %v1655_v7 = vor.u32 %v2054_v4, %v1654_v2 }
   0x4   :  { %v1783_v8 = vor.u32 %v2086_v6, %v1782_v5  ;;  %v1910_v9 = vld [vmem:[%s3390_s3 + $0x3e0] sm:$0xf]  ;;  %v2118_v10 = vld [vmem:[%s3390_s3 + $0x3ec] sm:$0xf0]  ;;  %820 = vmatpush.bf16.msra.mxu0 %v1527_v3 }
   0x5   :  { %v1510_v11 = vld [vmem:[%s3390_s3 + $0xc0] sm:$0xf]  ;;  %v1911_v12 = vor.u32 %v2118_v10, %v1910_v9  ;;  %v2018_v13 = vld [vmem:[%s3390_s3 + $0xcc] sm:$0xf0]  ;;  %833 = vmatpush.bf16.msra.mxu1 %v1655_v7 }
   0x6   :  { %v1638_v14 = vld [vmem:[%s3390_s3 + $0x1c0] sm:$0xf]  ;;  %v2050_v15 = vld [vmem:[%s3390_s3 + $0x1cc] sm:$0xf0]  ;;  %846 = vmatpush.bf16.msra.mxu2 %v1783_v8  ;;  %v1511_v16 = vor.u32 %v2018_v13, %v1510_v11 }
   0x7   :  { %v1639_v17 = vor.u32 %v2050_v15, %v1638_v14  ;;  %v1766_v18 = vld [vmem:[%s3390_s3 + $0x2c0] sm:$0xf]  ;;  %v2082_v19 = vld [vmem:[%s3390_s3 + $0x2cc] sm:$0xf0]  ;;  %859 = vmatpush.bf16.msra.mxu3 %v1911_v12 }
   0x8   :  { %v1894_v20 = vld [vmem:[%s3390_s3 + $0x3c0] sm:$0xf]  ;;  %v1767_v21 = vor.u32 %v2082_v19, %v1766_v18  ;;  %v2114_v22 = vld [vmem:[%s3390_s3 + $0x3cc] sm:$0xf0]  ;;  %821 = vmatpush.bf16.msra.mxu0 %v1511_v16 }
   0x9   :  { %v1494_v23 = vld [vmem:[%s3390_s3 + $0xa0] sm:$0xf]  ;;  %v2014_v24 = vld [vmem:[%s3390_s3 + $0xac] sm:$0xf0]  ;;  %v1895_v25 = vor.u32 %v2114_v22, %v1894_v20  ;;  %834 = vmatpush.bf16.msra.mxu1 %v1639_v17 }
   0xa   :  { %v1622_v26 = vld [vmem:[%s3390_s3 + $0x1a0] sm:$0xf]  ;;  %v2046_v27 = vld [vmem:[%s3390_s3 + $0x1ac] sm:$0xf0]  ;;  %v1495_v29 = vor.u32 %v2014_v24, %v1494_v23  ;;  %847 = vmatpush.bf16.msra.mxu2 %v1767_v21 }
   0xb   :  { %v1750_v28 = vld [vmem:[%s3390_s3 + $0x2a0] sm:$0xf]  ;;  %v2078_v30 = vld [vmem:[%s3390_s3 + $0x2ac] sm:$0xf0]  ;;  %v1623_v33 = vor.u32 %v2046_v27, %v1622_v26  ;;  %860 = vmatpush.bf16.msra.mxu3 %v1895_v25 }
   0xc   :  { %v1878_v31 = vld [vmem:[%s3390_s3 + $0x3a0] sm:$0xf]  ;;  %v2110_v32 = vld [vmem:[%s3390_s3 + $0x3ac] sm:$0xf0]  ;;  %v1751_v34 = vor.u32 %v2078_v30, %v1750_v28  ;;  %822 = vmatpush.bf16.msra.mxu0 %v1495_v29  ;;  %v2020_v28 = vld [vmem:[%s3390_s3 + $0xe4] sm:$0xf] }
   0xd   :  { %v1478_v35 = vld [vmem:[%s3390_s3 + $0x80] sm:$0xf]  ;;  %v2010_v36 = vld [vmem:[%s3390_s3 + $0x8c] sm:$0xf0]  ;;  %v1879_v38 = vor.u32 %v2110_v32, %v1878_v31  ;;  %835 = vmatpush.bf16.msra.mxu1 %v1623_v33  ;;  %v1528_v29 = vld [vmem:[%s3390_s3 + $0xf0] sm:$0xf0] }
   0xe   :  { %v1606_v37 = vld [vmem:[%s3390_s3 + $0x180] sm:$0xf]  ;;  %v2042_v39 = vld [vmem:[%s3390_s3 + $0x18c] sm:$0xf0]  ;;  %v1479_v44 = vor.u32 %v2010_v36, %v1478_v35  ;;  %848 = vmatpush.bf16.msra.mxu2 %v1751_v34  ;;  %v2052_v30 = vld [vmem:[%s3390_s3 + $0x1e4] sm:$0xf] }
   0xf   :  { %v1734_v40 = vld [vmem:[%s3390_s3 + $0x280] sm:$0xf]  ;;  %v2074_v41 = vld [vmem:[%s3390_s3 + $0x28c] sm:$0xf0]  ;;  %v1607_v45 = vor.u32 %v2042_v39, %v1606_v37  ;;  %861 = vmatpush.bf16.msra.mxu3 %v1879_v38  ;;  %v1656_v32 = vld [vmem:[%s3390_s3 + $0x1f0] sm:$0xf0] }
  0x10   :  { %v1862_v42 = vld [vmem:[%s3390_s3 + $0x380] sm:$0xf]  ;;  %v2106_v43 = vld [vmem:[%s3390_s3 + $0x38c] sm:$0xf0]  ;;  %v1735_v46 = vor.u32 %v2074_v41, %v1734_v40  ;;  %823 = vmatpush.bf16.msra.mxu0 %v1479_v44  ;;  %v2084_v33 = vld [vmem:[%s3390_s3 + $0x2e4] sm:$0xf]  ;;  %v1531_v40 = vor.u32 %v2020_v28, %v1528_v29  ;;  %v1659_v41 = vor.u32 %v2052_v30, %v1656_v32 }
  0x11   :  { %v1462_v47 = vld [vmem:[%s3390_s3 + $0x60] sm:$0xf]  ;;  %v2006_v48 = vld [vmem:[%s3390_s3 + $0x6c] sm:$0xf0]  ;;  %v1863_v50 = vor.u32 %v2106_v43, %v1862_v42  ;;  %836 = vmatpush.bf16.msra.mxu1 %v1607_v45  ;;  %v1784_v34 = vld [vmem:[%s3390_s3 + $0x2f0] sm:$0xf0] }
  0x12   :  { %v1590_v49 = vld [vmem:[%s3390_s3 + $0x160] sm:$0xf]  ;;  %v2038_v51 = vld [vmem:[%s3390_s3 + $0x16c] sm:$0xf0]  ;;  %v1463_v56 = vor.u32 %v2006_v48, %v1462_v47  ;;  %849 = vmatpush.bf16.msra.mxu2 %v1735_v46  ;;  %v2116_v37 = vld [vmem:[%s3390_s3 + $0x3e4] sm:$0xf]  ;;  %v1787_v42 = vor.u32 %v2084_v33, %v1784_v34 }
  0x13   :  { %v1718_v52 = vld [vmem:[%s3390_s3 + $0x260] sm:$0xf]  ;;  %v2070_v53 = vld [vmem:[%s3390_s3 + $0x26c] sm:$0xf0]  ;;  %v1591_v57 = vor.u32 %v2038_v51, %v1590_v49  ;;  %862 = vmatpush.bf16.msra.mxu3 %v1863_v50  ;;  %v1912_v38 = vld [vmem:[%s3390_s3 + $0x3f0] sm:$0xf0] }
  0x14   :  { %v1846_v54 = vld [vmem:[%s3390_s3 + $0x360] sm:$0xf]  ;;  %v2102_v55 = vld [vmem:[%s3390_s3 + $0x36c] sm:$0xf0]  ;;  %v1719_v58 = vor.u32 %v2070_v53, %v1718_v52  ;;  %824 = vmatpush.bf16.msra.mxu0 %v1463_v56  ;;  %v2016_v43 = vld [vmem:[%s3390_s3 + $0xc4] sm:$0xf]  ;;  %v1915_v46 = vor.u32 %v2116_v37, %v1912_v38 }
  0x15   :  { %v1446_v59 = vld [vmem:[%s3390_s3 + $0x40] sm:$0xf]  ;;  %v2002_v60 = vld [vmem:[%s3390_s3 + $0x4c] sm:$0xf0]  ;;  %v1847_v62 = vor.u32 %v2102_v55, %v1846_v54  ;;  %837 = vmatpush.bf16.msra.mxu1 %v1591_v57  ;;  %v1512_v44 = vld [vmem:[%s3390_s3 + $0xd0] sm:$0xf0] }
  0x16   :  { %v1574_v61 = vld [vmem:[%s3390_s3 + $0x140] sm:$0xf]  ;;  %v2034_v63 = vld [vmem:[%s3390_s3 + $0x14c] sm:$0xf0]  ;;  %v1447_v4 = vor.u32 %v2002_v60, %v1446_v59  ;;  %850 = vmatpush.bf16.msra.mxu2 %v1719_v58  ;;  %v2048_v45 = vld [vmem:[%s3390_s3 + $0x1c4] sm:$0xf]  ;;  %v1515_v53 = vor.u32 %v2016_v43, %v1512_v44 }
  0x17   :  { %v1702_v0 = vld [vmem:[%s3390_s3 + $0x240] sm:$0xf]  ;;  %v2066_v1 = vld [vmem:[%s3390_s3 + $0x24c] sm:$0xf0]  ;;  %v1575_v5 = vor.u32 %v2034_v63, %v1574_v61  ;;  %863 = vmatpush.bf16.msra.mxu3 %v1847_v62  ;;  %v1640_v47 = vld [vmem:[%s3390_s3 + $0x1d0] sm:$0xf0] }
  0x18   :  { %v1830_v2 = vld [vmem:[%s3390_s3 + $0x340] sm:$0xf]  ;;  %v2098_v3 = vld [vmem:[%s3390_s3 + $0x34c] sm:$0xf0]  ;;  %v1703_v6 = vor.u32 %v2066_v1, %v1702_v0  ;;  %825 = vmatpush.bf16.msra.mxu0 %v1447_v4  ;;  %v2080_v48 = vld [vmem:[%s3390_s3 + $0x2c4] sm:$0xf]  ;;  %v1643_v54 = vor.u32 %v2048_v45, %v1640_v47 }
  0x19   :  { %v1430_v7 = vld [vmem:[%s3390_s3 + $0x20] sm:$0xf]  ;;  %v1998_v8 = vld [vmem:[%s3390_s3 + $0x2c] sm:$0xf0]  ;;  %v1831_v10 = vor.u32 %v2098_v3, %v1830_v2  ;;  %838 = vmatpush.bf16.msra.mxu1 %v1575_v5  ;;  %v1768_v49 = vld [vmem:[%s3390_s3 + $0x2d0] sm:$0xf0] }
  0x1a   :  { %v1558_v9 = vld [vmem:[%s3390_s3 + $0x120] sm:$0xf]  ;;  %v2030_v11 = vld [vmem:[%s3390_s3 + $0x12c] sm:$0xf0]  ;;  %v1431_v16 = vor.u32 %v1998_v8, %v1430_v7  ;;  %851 = vmatpush.bf16.msra.mxu2 %v1703_v6  ;;  %v2112_v50 = vld [vmem:[%s3390_s3 + $0x3c4] sm:$0xf]  ;;  %v1771_v55 = vor.u32 %v2080_v48, %v1768_v49 }
  0x1b   :  { %v1686_v12 = vld [vmem:[%s3390_s3 + $0x220] sm:$0xf]  ;;  %v2062_v13 = vld [vmem:[%s3390_s3 + $0x22c] sm:$0xf0]  ;;  %v1559_v19 = vor.u32 %v2030_v11, %v1558_v9  ;;  %864 = vmatpush.bf16.msra.mxu3 %v1831_v10  ;;  %v1896_v51 = vld [vmem:[%s3390_s3 + $0x3d0] sm:$0xf0] }
  0x1c   :  { %v1814_v14 = vld [vmem:[%s3390_s3 + $0x320] sm:$0xf]  ;;  %v2094_v15 = vld [vmem:[%s3390_s3 + $0x32c] sm:$0xf0]  ;;  %v1687_v20 = vor.u32 %v2062_v13, %v1686_v12  ;;  %826 = vmatpush.bf16.msra.mxu0 %v1431_v16  ;;  %v2012_v56 = vld [vmem:[%s3390_s3 + $0xa4] sm:$0xf]  ;;  %v1899_v59 = vor.u32 %v2112_v50, %v1896_v51 }
  0x1d   :  { %v1414_v17 = vld [vmem:[%s3390_s3] sm:$0xf]  ;;  %v1994_v18 = vld [vmem:[%s3390_s3 + $0xc] sm:$0xf0]  ;;  %v1815_v24 = vor.u32 %v2094_v15, %v1814_v14  ;;  %839 = vmatpush.bf16.msra.mxu1 %v1559_v19  ;;  %v1496_v57 = vld [vmem:[%s3390_s3 + $0xb0] sm:$0xf0] }
  0x1e   :  { %v1542_v21 = vld [vmem:[%s3390_s3 + $0x100] sm:$0xf]  ;;  %v2026_v22 = vld [vmem:[%s3390_s3 + $0x10c] sm:$0xf0]  ;;  %v1415_v31 = vor.u32 %v1994_v18, %v1414_v17  ;;  %852 = vmatpush.bf16.msra.mxu2 %v1687_v20  ;;  %v2044_v58 = vld [vmem:[%s3390_s3 + $0x1a4] sm:$0xf]  ;;  %v1499_v1 = vor.u32 %v2012_v56, %v1496_v57 }
  0x1f   :  { %v1670_v23 = vld [vmem:[%s3390_s3 + $0x200] sm:$0xf]  ;;  %v2058_v25 = vld [vmem:[%s3390_s3 + $0x20c] sm:$0xf0]  ;;  %v1543_v35 = vor.u32 %v2026_v22, %v1542_v21  ;;  %865 = vmatpush.bf16.msra.mxu3 %v1815_v24  ;;  %v1624_v60 = vld [vmem:[%s3390_s3 + $0x1b0] sm:$0xf0] }
  0x20   :  { %v1798_v26 = vld [vmem:[%s3390_s3 + $0x300] sm:$0xf]  ;;  %v2090_v27 = vld [vmem:[%s3390_s3 + $0x30c] sm:$0xf0]  ;;  %v1671_v36 = vor.u32 %v2058_v25, %v1670_v23  ;;  %827 = vmatpush.bf16.msra.mxu0 %v1415_v31  ;;  %v2076_v61 = vld [vmem:[%s3390_s3 + $0x2a4] sm:$0xf]  ;;  %v1627_v5 = vor.u32 %v2044_v58, %v1624_v60 }
  0x21   :  { %v1799_v39 = vor.u32 %v2090_v27, %v1798_v26  ;;  %840 = vmatpush.bf16.msra.mxu1 %v1543_v35  ;;  %v33_v52 = vld [vmem:[%s3391_s0] sm:$0xff]  ;;  %v1752_v62 = vld [vmem:[%s3390_s3 + $0x2b0] sm:$0xf0] }
  0x22   :  { %853 = vmatpush.bf16.msra.mxu2 %v1671_v36  ;;  %35 = vst [vmem:[#allocation1] ss:$4 sm:$0xff] %v33_v52  ;;  %v2108_v63 = vld [vmem:[%s3390_s3 + $0x3a4] sm:$0xf]  ;;  %v1880_v0 = vld [vmem:[%s3390_s3 + $0x3b0] sm:$0xf0]  ;;  %v1755_v6 = vor.u32 %v2076_v61, %v1752_v62 }
  0x23   :  { %866 = vmatpush.bf16.msra.mxu3 %v1799_v39  ;;  %v2008_v2 = vld [vmem:[%s3390_s3 + $0x84] sm:$0xf]  ;;  %v1480_v3 = vld [vmem:[%s3390_s3 + $0x90] sm:$0xf0]  ;;  %v1883_v10 = vor.u32 %v2108_v63, %v1880_v0 }
  0x24   :  { %872 = vmatpush.bf16.msrb.mxu0 %v1531_v40  ;;  %v2040_v4 = vld [vmem:[%s3390_s3 + $0x184] sm:$0xf]  ;;  %v1608_v7 = vld [vmem:[%s3390_s3 + $0x190] sm:$0xf0]  ;;  %v1483_v17 = vor.u32 %v2008_v2, %v1480_v3 }
  0x25   :  { %885 = vmatpush.bf16.msrb.mxu1 %v1659_v41  ;;  %v2072_v8 = vld [vmem:[%s3390_s3 + $0x284] sm:$0xf]  ;;  %v1736_v9 = vld [vmem:[%s3390_s3 + $0x290] sm:$0xf0]  ;;  %v1611_v18 = vor.u32 %v2040_v4, %v1608_v7  ;;  %v2023_v7 = vld [vmem:[%s3390_s3 + $0xf4] sm:$0xf0] }
  0x26   :  { %898 = vmatpush.bf16.msrb.mxu2 %v1787_v42  ;;  %v2104_v11 = vld [vmem:[%s3390_s3 + $0x384] sm:$0xf]  ;;  %v1864_v12 = vld [vmem:[%s3390_s3 + $0x390] sm:$0xf0]  ;;  %v1739_v23 = vor.u32 %v2072_v8, %v1736_v9  ;;  %v1662_v8 = vld [vmem:[%s3390_s3 + $0x1e8] sm:$0xf] }
  0x27   :  { %911 = vmatpush.bf16.msrb.mxu3 %v1915_v46  ;;  %v1096_v13 = vld [vmem:[%s3392_s1] sm:$0xff]  ;;  %v1464_v24 = vld [vmem:[%s3390_s3 + $0x70] sm:$0xf0]  ;;  %v1867_v28 = vor.u32 %v2104_v11, %v1864_v12  ;;  %v1790_v11 = vld [vmem:[%s3390_s3 + $0x2e8] sm:$0xf] }
  0x28   :  { %873 = vmatpush.bf16.msrb.mxu0 %v1515_v53  ;;  %v2004_v15 = vld [vmem:[%s3390_s3 + $0x64] sm:$0xf]  ;;  %v1592_v29 = vld [vmem:[%s3390_s3 + $0x170] sm:$0xf0]  ;;  %v2087_v12 = vld [vmem:[%s3390_s3 + $0x2f4] sm:$0xf0] }
  0x29   :  { %886 = vmatpush.bf16.msrb.mxu1 %v1643_v54  ;;  %v38_v14 = vld.sshfl [vmem:[#allocation1 + $0x10] sm:$0xff pattern:$0x73625140]  ;;  %v36_v16 = vld.sshfl [vmem:[#allocation1] sm:$0xff pattern:$0x73625140]  ;;  %v1467_v34 = vor.u32 %v2004_v15, %v1464_v24 }
  0x2a   :  { %899 = vmatpush.bf16.msrb.mxu2 %v1771_v55  ;;  %v2465_v19 = vpack.c.bf16 %v38_v14, %v38_v14  ;;  %v2467_v20 = vpack.c.bf16 %v36_v16, %v36_v16  ;;  %v39_v21 = vld.sshfl [vmem:[#allocation1 + $0x18] sm:$0xff pattern:$0x73625140]  ;;  %v37_v22 = vld.sshfl [vmem:[#allocation1 + $0x8] sm:$0xff pattern:$0x73625140] }
  0x2b   :  { %912 = vmatpush.bf16.msrb.mxu3 %v1899_v59  ;;  %v2036_v25 = vld [vmem:[%s3390_s3 + $0x164] sm:$0xf]  ;;  %v2475_v26 = vpack.c.bf16 %v39_v21, %v39_v21  ;;  %v2477_v27 = vpack.c.bf16 %v37_v22, %v37_v22  ;;  %1163 = vst [vmem:[#allocation1] ss:$4 sm:$0xff] %v1096_v13  ;;  %v1720_v31 = vld [vmem:[%s3390_s3 + $0x270] sm:$0xf0]  ;;  %v1791_v22 = vor.u32 %v2087_v12, %v1790_v11 }
  0x2c   :  { %874 = vmatpush.bf16.msrb.mxu0 %v1499_v1  ;;  %854 = vmatmul.bf16.vlgmr.msra.gmra.mxu2 %v2465_v19  ;;  %v2068_v30 = vld [vmem:[%s3390_s3 + $0x264] sm:$0xf]  ;;  %v1848_v33 = vld [vmem:[%s3390_s3 + $0x370] sm:$0xf0]  ;;  %v1595_v35 = vor.u32 %v2036_v25, %v1592_v29  ;;  %v1918_v15 = vld [vmem:[%s3390_s3 + $0x3e8] sm:$0xf] }
  0x2d   :  { %887 = vmatpush.bf16.msrb.mxu1 %v1627_v5  ;;  %v2100_v32 = vld [vmem:[%s3390_s3 + $0x364] sm:$0xf]  ;;  %828 = vmatmul.bf16.vlgmr.msra.gmra.mxu0 %v2467_v20  ;;  %v1723_v36 = vor.u32 %v2068_v30, %v1720_v31  ;;  %v1448_v38 = vld [vmem:[%s3390_s3 + $0x50] sm:$0xf0]  ;;  %v2119_v16 = vld [vmem:[%s3390_s3 + $0x3f4] sm:$0xf0] }
  0x2e   :  { %900 = vmatpush.bf16.msrb.mxu2 %v1755_v6  ;;  %867 = vmatmul.bf16.vlgmr.msra.gmra.mxu3 %v2475_v26  ;;  %v2000_v37 = vld [vmem:[%s3390_s3 + $0x44] sm:$0xf]  ;;  %v1851_v40 = vor.u32 %v2100_v32, %v1848_v33  ;;  %v1576_v41 = vld [vmem:[%s3390_s3 + $0x150] sm:$0xf0]  ;;  %v1534_v6 = vld [vmem:[%s3390_s3 + $0xe8] sm:$0xf] }
  0x2f   :  { %913 = vmatpush.bf16.msrb.mxu3 %v1883_v10  ;;  %841 = vmatmul.bf16.vlgmr.msra.gmra.mxu1 %v2477_v27  ;;  %v2032_v39 = vld [vmem:[%s3390_s3 + $0x144] sm:$0xf]  ;;  %v1704_v43 = vld [vmem:[%s3390_s3 + $0x250] sm:$0xf0]  ;;  %v1451_v46 = vor.u32 %v2000_v37, %v1448_v38  ;;  %v2055_v10 = vld [vmem:[%s3390_s3 + $0x1f4] sm:$0xf0] }
  0x30   :  { %875 = vmatpush.bf16.msrb.mxu0 %v1483_v17  ;;  %v2064_v42 = vld [vmem:[%s3390_s3 + $0x244] sm:$0xf]  ;;  %v1832_v45 = vld [vmem:[%s3390_s3 + $0x350] sm:$0xf0]  ;;  %v1579_v47 = vor.u32 %v2032_v39, %v1576_v41  ;;  %v1663_v21 = vor.u32 %v2055_v10, %v1662_v8  ;;  %v2019_v24 = vld [vmem:[%s3390_s3 + $0xd4] sm:$0xf0] }
  0x31   :  { %888 = vmatpush.bf16.msrb.mxu1 %v1611_v18  ;;  %v2096_v44 = vld [vmem:[%s3390_s3 + $0x344] sm:$0xf]  ;;  %v1707_v48 = vor.u32 %v2064_v42, %v1704_v43  ;;  %v1432_v50 = vld [vmem:[%s3390_s3 + $0x30] sm:$0xf0]  ;;  %v1535_v18 = vor.u32 %v2023_v7, %v1534_v6  ;;  %v1646_v25 = vld [vmem:[%s3390_s3 + $0x1c8] sm:$0xf] }
  0x32   :  { %901 = vmatpush.bf16.msrb.mxu2 %v1739_v23  ;;  %v1996_v49 = vld [vmem:[%s3390_s3 + $0x24] sm:$0xf]  ;;  %v1835_v52 = vor.u32 %v2096_v44, %v1832_v45  ;;  %v1560_v53 = vld [vmem:[%s3390_s3 + $0x130] sm:$0xf0]  ;;  %v1518_v23 = vld [vmem:[%s3390_s3 + $0xc8] sm:$0xf] }
  0x33   :  { %914 = vmatpush.bf16.msrb.mxu3 %v1867_v28  ;;  %v2028_v51 = vld [vmem:[%s3390_s3 + $0x124] sm:$0xf]  ;;  %v1688_v55 = vld [vmem:[%s3390_s3 + $0x230] sm:$0xf0]  ;;  %v1435_v58 = vor.u32 %v1996_v49, %v1432_v50  ;;  %v1919_v28 = vor.u32 %v2119_v16, %v1918_v15  ;;  %v2051_v29 = vld [vmem:[%s3390_s3 + $0x1d4] sm:$0xf0] }
  0x34   :  { %876 = vmatpush.bf16.msrb.mxu0 %v1467_v34  ;;  %v2060_v54 = vld [vmem:[%s3390_s3 + $0x224] sm:$0xf]  ;;  %v1816_v57 = vld [vmem:[%s3390_s3 + $0x330] sm:$0xf0]  ;;  %v1563_v61 = vor.u32 %v2028_v51, %v1560_v53  ;;  %v1774_v30 = vld [vmem:[%s3390_s3 + $0x2c8] sm:$0xf]  ;;  %v1519_v34 = vor.u32 %v2019_v24, %v1518_v23 }
  0x35   :  { %889 = vmatpush.bf16.msrb.mxu1 %v1595_v35  ;;  %v2092_v56 = vld [vmem:[%s3390_s3 + $0x324] sm:$0xf]  ;;  %v1416_v60 = vld [vmem:[%s3390_s3 + $0x10] sm:$0xf0]  ;;  %v1691_v62 = vor.u32 %v2060_v54, %v1688_v55  ;;  %v2083_v31 = vld [vmem:[%s3390_s3 + $0x2d4] sm:$0xf0]  ;;  %v1647_v35 = vor.u32 %v2051_v29, %v1646_v25 }
  0x36   :  { %902 = vmatpush.bf16.msrb.mxu2 %v1723_v36  ;;  %v1992_v59 = vld [vmem:[%s3390_s3 + $0x4] sm:$0xf]  ;;  %v1544_v0 = vld [vmem:[%s3390_s3 + $0x110] sm:$0xf0]  ;;  %v1819_v2 = vor.u32 %v2092_v56, %v1816_v57  ;;  %v1902_v32 = vld [vmem:[%s3390_s3 + $0x3c8] sm:$0xf]  ;;  %v1775_v36 = vor.u32 %v2083_v31, %v1774_v30 }
  0x37   :  { %915 = vmatpush.bf16.msrb.mxu3 %v1851_v40  ;;  %v2024_v63 = vld [vmem:[%s3390_s3 + $0x104] sm:$0xf]  ;;  %v1672_v3 = vld [vmem:[%s3390_s3 + $0x210] sm:$0xf0]  ;;  %v1419_v9 = vor.u32 %v1992_v59, %v1416_v60  ;;  %v2115_v33 = vld [vmem:[%s3390_s3 + $0x3d4] sm:$0xf0] }
  0x38   :  { %877 = vmatpush.bf16.msrb.mxu0 %v1451_v46  ;;  %v2056_v1 = vld [vmem:[%s3390_s3 + $0x204] sm:$0xf]  ;;  %v1800_v5 = vld [vmem:[%s3390_s3 + $0x310] sm:$0xf0]  ;;  %v1547_v13 = vor.u32 %v2024_v63, %v1544_v0  ;;  %v1502_v37 = vld [vmem:[%s3390_s3 + $0xa8] sm:$0xf]  ;;  %v1903_v40 = vor.u32 %v2115_v33, %v1902_v32 }
  0x39   :  { %890 = vmatpush.bf16.msrb.mxu1 %v1579_v47  ;;  %v2088_v4 = vld [vmem:[%s3390_s3 + $0x304] sm:$0xf]  ;;  %v1675_v14 = vor.u32 %v2056_v1, %v1672_v3  ;;  %v2015_v38 = vld [vmem:[%s3390_s3 + $0xb4] sm:$0xf0]  ;;  %v1630_v39 = vld [vmem:[%s3390_s3 + $0x1a8] sm:$0xf] }
  0x3a   :  { %903 = vmatpush.bf16.msrb.mxu2 %v1707_v48  ;;  %v1803_v17 = vor.u32 %v2088_v4, %v1800_v5  ;;  %v2047_v41 = vld [vmem:[%s3390_s3 + $0x1b4] sm:$0xf0]  ;;  %v1758_v42 = vld [vmem:[%s3390_s3 + $0x2a8] sm:$0xf]  ;;  %v1503_v46 = vor.u32 %v2015_v38, %v1502_v37 }
  0x3b   :  { %916 = vmatpush.bf16.msrb.mxu3 %v1835_v52  ;;  %v2079_v43 = vld [vmem:[%s3390_s3 + $0x2b4] sm:$0xf0]  ;;  %v1886_v44 = vld [vmem:[%s3390_s3 + $0x3a8] sm:$0xf]  ;;  %v1631_v47 = vor.u32 %v2047_v41, %v1630_v39 }
  0x3c   :  { %878 = vmatpush.bf16.msrb.mxu0 %v1435_v58  ;;  %v2111_v45 = vld [vmem:[%s3390_s3 + $0x3b4] sm:$0xf0]  ;;  %v1759_v48 = vor.u32 %v2079_v43, %v1758_v42  ;;  %v1486_v49 = vld [vmem:[%s3390_s3 + $0x88] sm:$0xf] }
  0x3d   :  { %891 = vmatpush.bf16.msrb.mxu1 %v1563_v61  ;;  %v2011_v50 = vld [vmem:[%s3390_s3 + $0x94] sm:$0xf0]  ;;  %v1614_v51 = vld [vmem:[%s3390_s3 + $0x188] sm:$0xf]  ;;  %v1887_v52 = vor.u32 %v2111_v45, %v1886_v44 }
  0x3e   :  { %904 = vmatpush.bf16.msrb.mxu2 %v1691_v62  ;;  %v2043_v53 = vld [vmem:[%s3390_s3 + $0x194] sm:$0xf0]  ;;  %v1742_v54 = vld [vmem:[%s3390_s3 + $0x288] sm:$0xf]  ;;  %v1487_v58 = vor.u32 %v2011_v50, %v1486_v49  ;;  %v1664_v50 = vld [vmem:[%s3390_s3 + $0x1f8] sm:$0xf0] }
  0x3f   :  { %917 = vmatpush.bf16.msrb.mxu3 %v1819_v2  ;;  %v2075_v55 = vld [vmem:[%s3390_s3 + $0x294] sm:$0xf0]  ;;  %v1870_v56 = vld [vmem:[%s3390_s3 + $0x388] sm:$0xf]  ;;  %v1615_v59 = vor.u32 %v2043_v53, %v1614_v51  ;;  %v2085_v51 = vld [vmem:[%s3390_s3 + $0x2ec] sm:$0xf] }
  0x40   :  { %879 = vmatpush.bf16.msrb.mxu0 %v1419_v9  ;;  %v2107_v57 = vld [vmem:[%s3390_s3 + $0x394] sm:$0xf0]  ;;  %v1743_v60 = vor.u32 %v2075_v55, %v1742_v54  ;;  %v1470_v61 = vld [vmem:[%s3390_s3 + $0x68] sm:$0xf]  ;;  %v2117_v55 = vld [vmem:[%s3390_s3 + $0x3ec] sm:$0xf] }
  0x41   :  { %892 = vmatpush.bf16.msrb.mxu1 %v1547_v13  ;;  %v2007_v62 = vld [vmem:[%s3390_s3 + $0x74] sm:$0xf0]  ;;  %v1598_v63 = vld [vmem:[%s3390_s3 + $0x168] sm:$0xf]  ;;  %v1871_v0 = vor.u32 %v2107_v57, %v1870_v56  ;;  %v1920_v56 = vld [vmem:[%s3390_s3 + $0x3f8] sm:$0xf0] }
  0x42   :  { %905 = vmatpush.bf16.msrb.mxu2 %v1675_v14  ;;  %v2039_v1 = vld [vmem:[%s3390_s3 + $0x174] sm:$0xf0]  ;;  %v1726_v2 = vld [vmem:[%s3390_s3 + $0x268] sm:$0xf]  ;;  %v1471_v6 = vor.u32 %v2007_v62, %v1470_v61  ;;  %v2017_v61 = vld [vmem:[%s3390_s3 + $0xcc] sm:$0xf] }
  0x43   :  { %918 = vmatpush.bf16.msrb.mxu3 %v1803_v17  ;;  %880 = vmatmul.bf16.vlgmr.msrb.gmra.mxu0 %v2467_v20  ;;  %v2071_v3 = vld [vmem:[%s3390_s3 + $0x274] sm:$0xf0]  ;;  %v1854_v4 = vld [vmem:[%s3390_s3 + $0x368] sm:$0xf]  ;;  %v1599_v7 = vor.u32 %v2039_v1, %v1598_v63  ;;  %v1520_v62 = vld [vmem:[%s3390_s3 + $0xd8] sm:$0xf0] }
  0x44   :  { %924 = vmatpush.bf16.msra.mxu0 %v1535_v18  ;;  %893 = vmatmul.bf16.vlgmr.msrb.gmra.mxu1 %v2477_v27  ;;  %v2103_v5 = vld [vmem:[%s3390_s3 + $0x374] sm:$0xf0]  ;;  %v1727_v8 = vor.u32 %v2071_v3, %v1726_v2  ;;  %v1454_v9 = vld [vmem:[%s3390_s3 + $0x48] sm:$0xf]  ;;  %v2049_v63 = vld [vmem:[%s3390_s3 + $0x1cc] sm:$0xf] }
  0x45   :  { %937 = vmatpush.bf16.msra.mxu1 %v1663_v21  ;;  %906 = vmatmul.bf16.vlgmr.msrb.gmra.mxu2 %v2465_v19  ;;  %v2003_v10 = vld [vmem:[%s3390_s3 + $0x54] sm:$0xf0]  ;;  %v1582_v11 = vld [vmem:[%s3390_s3 + $0x148] sm:$0xf]  ;;  %v1855_v12 = vor.u32 %v2103_v5, %v1854_v4  ;;  %v1648_v1 = vld [vmem:[%s3390_s3 + $0x1d8] sm:$0xf0] }
  0x46   :  { %950 = vmatpush.bf16.msra.mxu2 %v1791_v22  ;;  %919 = vmatmul.bf16.vlgmr.msrb.gmra.mxu3 %v2475_v26  ;;  %v2035_v13 = vld [vmem:[%s3390_s3 + $0x154] sm:$0xf0]  ;;  %v1710_v14 = vld [vmem:[%s3390_s3 + $0x248] sm:$0xf]  ;;  %v1455_v18 = vor.u32 %v2003_v10, %v1454_v9  ;;  %v2081_v2 = vld [vmem:[%s3390_s3 + $0x2cc] sm:$0xf] }
  0x47   :  { %963 = vmatpush.bf16.msra.mxu3 %v1919_v28  ;;  %v2067_v15 = vld [vmem:[%s3390_s3 + $0x254] sm:$0xf0]  ;;  %v1838_v16 = vld [vmem:[%s3390_s3 + $0x348] sm:$0xf]  ;;  %v1583_v21 = vor.u32 %v2035_v13, %v1582_v11  ;;  %v1776_v3 = vld [vmem:[%s3390_s3 + $0x2d8] sm:$0xf0] }
  0x48   :  { %925 = vmatpush.bf16.msra.mxu0 %v1519_v34  ;;  %v2099_v17 = vld [vmem:[%s3390_s3 + $0x354] sm:$0xf0]  ;;  %v1711_v22 = vor.u32 %v2067_v15, %v1710_v14  ;;  %v1438_v23 = vld [vmem:[%s3390_s3 + $0x28] sm:$0xf]  ;;  %v2113_v4 = vld [vmem:[%s3390_s3 + $0x3cc] sm:$0xf] }
  0x49   :  { %938 = vmatpush.bf16.msra.mxu1 %v1647_v35  ;;  %v1999_v24 = vld [vmem:[%s3390_s3 + $0x34] sm:$0xf0]  ;;  %v1566_v25 = vld [vmem:[%s3390_s3 + $0x128] sm:$0xf]  ;;  %v1839_v28 = vor.u32 %v2099_v17, %v1838_v16  ;;  %v1904_v5 = vld [vmem:[%s3390_s3 + $0x3d8] sm:$0xf0] }
  0x4a   :  { %951 = vmatpush.bf16.msra.mxu2 %v1775_v36  ;;  %v2031_v29 = vld [vmem:[%s3390_s3 + $0x134] sm:$0xf0]  ;;  %v1694_v30 = vld [vmem:[%s3390_s3 + $0x228] sm:$0xf]  ;;  %v1439_v34 = vor.u32 %v1999_v24, %v1438_v23  ;;  %v2013_v9 = vld [vmem:[%s3390_s3 + $0xac] sm:$0xf] }
  0x4b   :  { %964 = vmatpush.bf16.msra.mxu3 %v1903_v40  ;;  %v2063_v31 = vld [vmem:[%s3390_s3 + $0x234] sm:$0xf0]  ;;  %v1822_v32 = vld [vmem:[%s3390_s3 + $0x328] sm:$0xf]  ;;  %v1567_v37 = vor.u32 %v2031_v29, %v1566_v25  ;;  %v1504_v10 = vld [vmem:[%s3390_s3 + $0xb8] sm:$0xf0] }
  0x4c   :  { %926 = vmatpush.bf16.msra.mxu0 %v1503_v46  ;;  %v2095_v33 = vld [vmem:[%s3390_s3 + $0x334] sm:$0xf0]  ;;  %v1422_v35 = vld [vmem:[%s3390_s3 + $0x8] sm:$0xf]  ;;  %v1695_v38 = vor.u32 %v2063_v31, %v1694_v30  ;;  %v2021_v46 = vld [vmem:[%s3390_s3 + $0xec] sm:$0xf] }
  0x4d   :  { %939 = vmatpush.bf16.msra.mxu1 %v1631_v47  ;;  %v1995_v36 = vld [vmem:[%s3390_s3 + $0x14] sm:$0xf0]  ;;  %v1550_v39 = vld [vmem:[%s3390_s3 + $0x108] sm:$0xf]  ;;  %v1823_v42 = vor.u32 %v2095_v33, %v1822_v32  ;;  %v1536_v47 = vld [vmem:[%s3390_s3 + $0xf8] sm:$0xf0] }
  0x4e   :  { %952 = vmatpush.bf16.msra.mxu2 %v1759_v48  ;;  %v2027_v40 = vld [vmem:[%s3390_s3 + $0x114] sm:$0xf0]  ;;  %v1678_v41 = vld [vmem:[%s3390_s3 + $0x208] sm:$0xf]  ;;  %v2053_v48 = vld [vmem:[%s3390_s3 + $0x1ec] sm:$0xf]  ;;  %v1423_v49 = vor.u32 %v1995_v36, %v1422_v35 }
  0x4f   :  { %965 = vmatpush.bf16.msra.mxu3 %v1887_v52  ;;  %v2059_v43 = vld [vmem:[%s3390_s3 + $0x214] sm:$0xf0]  ;;  %v1806_v44 = vld [vmem:[%s3390_s3 + $0x308] sm:$0xf]  ;;  %v1792_v52 = vld [vmem:[%s3390_s3 + $0x2f8] sm:$0xf0]  ;;  %v1551_v53 = vor.u32 %v2027_v40, %v1550_v39 }
  0x50   :  { %927 = vmatpush.bf16.msra.mxu0 %v1487_v58  ;;  %v2091_v45 = vld [vmem:[%s3390_s3 + $0x314] sm:$0xf0]  ;;  %v1679_v54 = vor.u32 %v2059_v43, %v1678_v41  ;;  %v1539_v58 = vor.u32 %v2021_v46, %v1536_v47  ;;  %v2045_v11 = vld [vmem:[%s3390_s3 + $0x1ac] sm:$0xf]  ;;  %v1632_v13 = vld [vmem:[%s3390_s3 + $0x1b8] sm:$0xf0] }
  0x51   :  { %940 = vmatpush.bf16.msra.mxu1 %v1615_v59  ;;  %v1807_v57 = vor.u32 %v2091_v45, %v1806_v44  ;;  %v1667_v59 = vor.u32 %v2053_v48, %v1664_v50  ;;  %v2077_v14 = vld [vmem:[%s3390_s3 + $0x2ac] sm:$0xf]  ;;  %v1760_v15 = vld [vmem:[%s3390_s3 + $0x2b8] sm:$0xf0] }
  0x52   :  { %953 = vmatpush.bf16.msra.mxu2 %v1743_v60  ;;  %v1795_v60 = vor.u32 %v2085_v51, %v1792_v52  ;;  %v2109_v16 = vld [vmem:[%s3390_s3 + $0x3ac] sm:$0xf]  ;;  %v1888_v17 = vld [vmem:[%s3390_s3 + $0x3b8] sm:$0xf0] }
  0x53   :  { %966 = vmatpush.bf16.msra.mxu3 %v1871_v0  ;;  %v1923_v0 = vor.u32 %v2117_v55, %v1920_v56  ;;  %v2009_v23 = vld [vmem:[%s3390_s3 + $0x8c] sm:$0xf]  ;;  %v1488_v24 = vld [vmem:[%s3390_s3 + $0x98] sm:$0xf0] }
  0x54   :  { %928 = vmatpush.bf16.msra.mxu0 %v1471_v6  ;;  %v1523_v6 = vor.u32 %v2017_v61, %v1520_v62  ;;  %v2041_v25 = vld [vmem:[%s3390_s3 + $0x18c] sm:$0xf]  ;;  %v1616_v29 = vld [vmem:[%s3390_s3 + $0x198] sm:$0xf0] }
  0x55   :  { %941 = vmatpush.bf16.msra.mxu1 %v1599_v7  ;;  %v1651_v7 = vor.u32 %v2049_v63, %v1648_v1  ;;  %v2073_v30 = vld [vmem:[%s3390_s3 + $0x28c] sm:$0xf]  ;;  %v1744_v31 = vld [vmem:[%s3390_s3 + $0x298] sm:$0xf0]  ;;  %v1619_v35 = vor.u32 %v2041_v25, %v1616_v29  ;;  %v1954_v29 = vld [vmem:[%s3393_s4 + $0x2f0] sm:$0xff] }
  0x56   :  { %954 = vmatpush.bf16.msra.mxu2 %v1727_v8  ;;  %v1779_v8 = vor.u32 %v2081_v2, %v1776_v3  ;;  %v2105_v32 = vld [vmem:[%s3390_s3 + $0x38c] sm:$0xf]  ;;  %v1872_v33 = vld [vmem:[%s3390_s3 + $0x398] sm:$0xf0]  ;;  %v1747_v36 = vor.u32 %v2073_v30, %v1744_v31 }
  0x57   :  { %967 = vmatpush.bf16.msra.mxu3 %v1855_v12  ;;  %v1907_v12 = vor.u32 %v2113_v4, %v1904_v5  ;;  %v2037_v39 = vld [vmem:[%s3390_s3 + $0x16c] sm:$0xf]  ;;  %v1875_v40 = vor.u32 %v2105_v32, %v1872_v33  ;;  %v1600_v41 = vld [vmem:[%s3390_s3 + $0x178] sm:$0xf0]  ;;  %v1986_v33 = vld [vmem:[%s3393_s4 + $0x3f0] sm:$0xff] }
  0x58   :  { %929 = vmatpush.bf16.msra.mxu0 %v1455_v18  ;;  %v1507_v18 = vor.u32 %v2013_v9, %v1504_v10  ;;  %v1728_v43 = vld [vmem:[%s3390_s3 + $0x278] sm:$0xf0]  ;;  %v2101_v44 = vld [vmem:[%s3390_s3 + $0x36c] sm:$0xf]  ;;  %v1603_v47 = vor.u32 %v2037_v39, %v1600_v41  ;;  %v1934_v39 = vld [vmem:[%s3393_s4 + $0x250] sm:$0xff] }
  0x59   :  { %942 = vmatpush.bf16.msra.mxu1 %v1583_v21  ;;  %v1635_v21 = vor.u32 %v2045_v11, %v1632_v13  ;;  %v1856_v45 = vld [vmem:[%s3390_s3 + $0x378] sm:$0xf0]  ;;  %v2033_v51 = vld [vmem:[%s3390_s3 + $0x14c] sm:$0xf]  ;;  %v1950_v41 = vld [vmem:[%s3393_s4 + $0x2d0] sm:$0xff] }
  0x5a   :  { %955 = vmatpush.bf16.msra.mxu2 %v1711_v22  ;;  %v1763_v22 = vor.u32 %v2077_v14, %v1760_v15  ;;  %v1456_v50 = vld [vmem:[%s3390_s3 + $0x58] sm:$0xf0]  ;;  %v1859_v52 = vor.u32 %v2101_v44, %v1856_v45  ;;  %v2097_v56 = vld [vmem:[%s3390_s3 + $0x34c] sm:$0xf] }
  0x5b   :  { %968 = vmatpush.bf16.msra.mxu3 %v1839_v28  ;;  %v1891_v28 = vor.u32 %v2109_v16, %v1888_v17  ;;  %v1712_v55 = vld [vmem:[%s3390_s3 + $0x258] sm:$0xf0]  ;;  %v1997_v61 = vld [vmem:[%s3390_s3 + $0x2c] sm:$0xf] }
  0x5c   :  { %930 = vmatpush.bf16.msra.mxu0 %v1439_v34  ;;  %v1491_v34 = vor.u32 %v2009_v23, %v1488_v24  ;;  %v1440_v62 = vld [vmem:[%s3390_s3 + $0x38] sm:$0xf0]  ;;  %v2029_v63 = vld [vmem:[%s3390_s3 + $0x12c] sm:$0xf] }
  0x5d   :  { %943 = vmatpush.bf16.msra.mxu1 %v1567_v37  ;;  %v2005_v37 = vld [vmem:[%s3390_s3 + $0x6c] sm:$0xf]  ;;  %v1568_v1 = vld [vmem:[%s3390_s3 + $0x138] sm:$0xf0] }
  0x5e   :  { %956 = vmatpush.bf16.msra.mxu2 %v1695_v38  ;;  %v1472_v38 = vld [vmem:[%s3390_s3 + $0x78] sm:$0xf0]  ;;  %v2061_v2 = vld [vmem:[%s3390_s3 + $0x22c] sm:$0xf] }
  0x5f   :  { %969 = vmatpush.bf16.msra.mxu3 %v1823_v42  ;;  %v2069_v42 = vld [vmem:[%s3390_s3 + $0x26c] sm:$0xf]  ;;  %v1475_v46 = vor.u32 %v2005_v37, %v1472_v38  ;;  %v1696_v3 = vld [vmem:[%s3390_s3 + $0x238] sm:$0xf0]  ;;  %v1968_v38 = vld [vmem:[%s3393_s4 + $0x360] sm:$0xff] }
  0x60   :  { %931 = vmatpush.bf16.msra.mxu0 %v1423_v49  ;;  %v1731_v48 = vor.u32 %v2069_v42, %v1728_v43  ;;  %v2001_v49 = vld [vmem:[%s3390_s3 + $0x4c] sm:$0xf]  ;;  %v1824_v5 = vld [vmem:[%s3390_s3 + $0x338] sm:$0xf0] }
  0x61   :  { %944 = vmatpush.bf16.msra.mxu1 %v1551_v53  ;;  %v1584_v53 = vld [vmem:[%s3390_s3 + $0x158] sm:$0xf0]  ;;  %v2093_v4 = vld [vmem:[%s3390_s3 + $0x32c] sm:$0xf] }
  0x62   :  { %957 = vmatpush.bf16.msra.mxu2 %v1679_v54  ;;  %v2065_v54 = vld [vmem:[%s3390_s3 + $0x24c] sm:$0xf]  ;;  %v1424_v10 = vld [vmem:[%s3390_s3 + $0x18] sm:$0xf0] }
  0x63   :  { %970 = vmatpush.bf16.msra.mxu3 %v1807_v57  ;;  %932 = vmatmul.bf16.vlgmr.msra.gmra.mxu0 %v2467_v20  ;;  %v1840_v57 = vld [vmem:[%s3390_s3 + $0x358] sm:$0xf0]  ;;  %v1993_v9 = vld [vmem:[%s3390_s3 + $0xc] sm:$0xf] }
  0x64   :  { %976 = vmatpush.bf16.msrb.mxu0 %v1539_v58  ;;  %945 = vmatmul.bf16.vlgmr.msra.gmra.mxu1 %v2477_v27  ;;  %v1459_v58 = vor.u32 %v2001_v49, %v1456_v50  ;;  %v2025_v11 = vld [vmem:[%s3390_s3 + $0x10c] sm:$0xf]  ;;  %v1552_v13 = vld [vmem:[%s3390_s3 + $0x118] sm:$0xf0]  ;;  %v1948_v49 = vld [vmem:[%s3393_s4 + $0x2c0] sm:$0xff] }
  0x65   :  { %989 = vmatpush.bf16.msrb.mxu1 %v1667_v59  ;;  %958 = vmatmul.bf16.vlgmr.msra.gmra.mxu2 %v2465_v19  ;;  %v1587_v59 = vor.u32 %v2033_v51, %v1584_v53  ;;  %v2057_v14 = vld [vmem:[%s3390_s3 + $0x20c] sm:$0xf]  ;;  %v1680_v15 = vld [vmem:[%s3390_s3 + $0x218] sm:$0xf0] }
  0x66   :  { %1002 = vmatpush.bf16.msrb.mxu2 %v1795_v60  ;;  %971 = vmatmul.bf16.vlgmr.msra.gmra.mxu3 %v2475_v26  ;;  %v1715_v60 = vor.u32 %v2065_v54, %v1712_v55  ;;  %v2089_v16 = vld [vmem:[%s3390_s3 + $0x30c] sm:$0xf]  ;;  %v1808_v17 = vld [vmem:[%s3390_s3 + $0x318] sm:$0xf0]  ;;  %v1964_v54 = vld [vmem:[%s3393_s4 + $0x340] sm:$0xff] }
  0x67   :  { %1015 = vmatpush.bf16.msrb.mxu3 %v1923_v0  ;;  %v1843_v0 = vor.u32 %v2097_v56, %v1840_v57  ;;  %v1811_v23 = vor.u32 %v2089_v16, %v1808_v17  ;;  %v1939_v24 = vld [vmem:[%s3393_s4 + $0x278] sm:$0xff]  ;;  %v1937_v31 = vld [vmem:[%s3393_s4 + $0x268] sm:$0xff]  ;;  %v1930_v55 = vld [vmem:[%s3393_s4 + $0x230] sm:$0xff] }
  0x68   :  { %977 = vmatpush.bf16.msrb.mxu0 %v1523_v6  ;;  %v1443_v6 = vor.u32 %v1997_v61, %v1440_v62  ;;  %v1955_v25 = vld [vmem:[%s3393_s4 + $0x2f8] sm:$0xff]  ;;  %v1953_v32 = vld [vmem:[%s3393_s4 + $0x2e8] sm:$0xff]  ;;  %v1980_v56 = vld [vmem:[%s3393_s4 + $0x3c0] sm:$0xff] }
  0x69   :  { %990 = vmatpush.bf16.msrb.mxu1 %v1651_v7  ;;  %v1571_v7 = vor.u32 %v2029_v63, %v1568_v1  ;;  %v1971_v30 = vld [vmem:[%s3393_s4 + $0x378] sm:$0xff]  ;;  %v1933_v43 = vld [vmem:[%s3393_s4 + $0x248] sm:$0xff]  ;;  %v1946_v57 = vld [vmem:[%s3393_s4 + $0x2b0] sm:$0xff] }
  0x6a   :  { %1003 = vmatpush.bf16.msrb.mxu2 %v1779_v8  ;;  %v1699_v8 = vor.u32 %v2061_v2, %v1696_v3  ;;  %v1951_v37 = vld [vmem:[%s3393_s4 + $0x2d8] sm:$0xff]  ;;  %v1949_v45 = vld [vmem:[%s3393_s4 + $0x2c8] sm:$0xff]  ;;  %v1962_v62 = vld [vmem:[%s3393_s4 + $0x330] sm:$0xff] }
  0x6b   :  { %1016 = vmatpush.bf16.msrb.mxu3 %v1907_v12  ;;  %v1827_v12 = vor.u32 %v2093_v4, %v1824_v5  ;;  %v1967_v42 = vld [vmem:[%s3393_s4 + $0x358] sm:$0xff]  ;;  %v1965_v50 = vld [vmem:[%s3393_s4 + $0x348] sm:$0xff]  ;;  %v1928_v63 = vld [vmem:[%s3393_s4 + $0x220] sm:$0xff] }
  0x6c   :  { %978 = vmatpush.bf16.msrb.mxu0 %v1507_v18  ;;  %v1427_v18 = vor.u32 %v1993_v9, %v1424_v10  ;;  %v1983_v44 = vld [vmem:[%s3393_s4 + $0x3d8] sm:$0xff]  ;;  %v1945_v61 = vld [vmem:[%s3393_s4 + $0x2a8] sm:$0xff]  ;;  %v1944_v1 = vld [vmem:[%s3393_s4 + $0x2a0] sm:$0xff] }
  0x6d   :  { %991 = vmatpush.bf16.msrb.mxu1 %v1635_v21  ;;  %v1555_v21 = vor.u32 %v2025_v11, %v1552_v13  ;;  %v1931_v51 = vld [vmem:[%s3393_s4 + $0x238] sm:$0xff]  ;;  %v1961_v2 = vld [vmem:[%s3393_s4 + $0x328] sm:$0xff]  ;;  %v1926_v5 = vld [vmem:[%s3393_s4 + $0x210] sm:$0xff] }
  0x6e   :  { %1004 = vmatpush.bf16.msrb.mxu2 %v1763_v22  ;;  %v1683_v22 = vor.u32 %v2057_v14, %v1680_v15  ;;  %v1947_v53 = vld [vmem:[%s3393_s4 + $0x2b8] sm:$0xff]  ;;  %v1976_v10 = vld [vmem:[%s3393_s4 + $0x3a0] sm:$0xff]  ;;  %v1925_v11 = vld [vmem:[%s3393_s4 + $0x208] sm:$0xff] }
  0x6f   :  { %1017 = vmatpush.bf16.msrb.mxu3 %v1891_v28  ;;  %v1938_v28 = vld [vmem:[%s3393_s4 + $0x270] sm:$0xff]  ;;  %v1927_v3 = vld [vmem:[%s3393_s4 + $0x218] sm:$0xff]  ;;  %v1924_v15 = vld [vmem:[%s3393_s4 + $0x200] sm:$0xff] }
  0x70   :  { %979 = vmatpush.bf16.msrb.mxu0 %v1491_v34  ;;  %v1969_v34 = vld [vmem:[%s3393_s4 + $0x368] sm:$0xff]  ;;  %v1943_v4 = vld [vmem:[%s3393_s4 + $0x298] sm:$0xff]  ;;  %v1958_v13 = vld [vmem:[%s3393_s4 + $0x310] sm:$0xff] }
  0x71   :  { %992 = vmatpush.bf16.msrb.mxu1 %v1619_v35  ;;  %v1935_v35 = vld [vmem:[%s3393_s4 + $0x258] sm:$0xff]  ;;  %v1974_v16 = vld [vmem:[%s3393_s4 + $0x390] sm:$0xff] }
  0x72   :  { %1005 = vmatpush.bf16.msrb.mxu2 %v1747_v36  ;;  %v1985_v36 = vld [vmem:[%s3393_s4 + $0x3e8] sm:$0xff]  ;;  %v1959_v9 = vld [vmem:[%s3393_s4 + $0x318] sm:$0xff] }
  0x73   :  { %1018 = vmatpush.bf16.msrb.mxu3 %v1875_v40  ;;  %v1984_v40 = vld [vmem:[%s3393_s4 + $0x3e0] sm:$0xff]  ;;  %v1975_v14 = vld [vmem:[%s3393_s4 + $0x398] sm:$0xff] }
  0x74   :  { %980 = vmatpush.bf16.msrb.mxu0 %v1475_v46  ;;  %v1966_v46 = vld [vmem:[%s3393_s4 + $0x350] sm:$0xff]  ;;  %v1047_v17 = vld [vmem:[%s3393_s4 + $0x78] sm:$0xff] }
  0x75   :  { %993 = vmatpush.bf16.msrb.mxu1 %v1603_v47  ;;  %v1932_v47 = vld [vmem:[%s3393_s4 + $0x240] sm:$0xff] }
  0x76   :  { %1006 = vmatpush.bf16.msrb.mxu2 %v1731_v48  ;;  %v1982_v48 = vld [vmem:[%s3393_s4 + $0x3d0] sm:$0xff] }
  0x77   :  { %1019 = vmatpush.bf16.msrb.mxu3 %v1859_v52  ;;  %v1981_v52 = vld [vmem:[%s3393_s4 + $0x3c8] sm:$0xff] }
  0x78   :  { %981 = vmatpush.bf16.msrb.mxu0 %v1459_v58  ;;  %v1963_v58 = vld [vmem:[%s3393_s4 + $0x338] sm:$0xff] }
  0x79   :  { %994 = vmatpush.bf16.msrb.mxu1 %v1587_v59  ;;  %v1929_v59 = vld [vmem:[%s3393_s4 + $0x228] sm:$0xff] }
  0x7a   :  { %1007 = vmatpush.bf16.msrb.mxu2 %v1715_v60  ;;  %v1979_v60 = vld [vmem:[%s3393_s4 + $0x3b8] sm:$0xff] }
  0x7b   :  { %1020 = vmatpush.bf16.msrb.mxu3 %v1843_v0  ;;  %v1978_v0 = vld [vmem:[%s3393_s4 + $0x3b0] sm:$0xff] }
  0x7c   :  { %982 = vmatpush.bf16.msrb.mxu0 %v1443_v6  ;;  %v1960_v6 = vld [vmem:[%s3393_s4 + $0x320] sm:$0xff] }
  0x7d   :  { %995 = vmatpush.bf16.msrb.mxu1 %v1571_v7  ;;  %v1977_v7 = vld [vmem:[%s3393_s4 + $0x3a8] sm:$0xff] }
  0x7e   :  { %1008 = vmatpush.bf16.msrb.mxu2 %v1699_v8  ;;  %v1942_v8 = vld [vmem:[%s3393_s4 + $0x290] sm:$0xff] }
  0x7f   :  { %1021 = vmatpush.bf16.msrb.mxu3 %v1827_v12  ;;  %v1941_v12 = vld [vmem:[%s3393_s4 + $0x288] sm:$0xff] }
  0x80   :  { %983 = vmatpush.bf16.msrb.mxu0 %v1427_v18  ;;  %v1940_v18 = vld [vmem:[%s3393_s4 + $0x280] sm:$0xff] }
  0x81   :  { %996 = vmatpush.bf16.msrb.mxu1 %v1555_v21  ;;  %v1063_v21 = vld [vmem:[%s3393_s4 + $0xf8] sm:$0xff] }
  0x82   :  { %1009 = vmatpush.bf16.msrb.mxu2 %v1683_v22  ;;  %v1957_v22 = vld [vmem:[%s3393_s4 + $0x308] sm:$0xff] }
  0x83   :  { %1022 = vmatpush.bf16.msrb.mxu3 %v1811_v23  ;;  %984 = vmatmul.bf16.vlgmr.msrb.gmra.mxu0 %v2467_v20  ;;  %v1987_v20 = vld [vmem:[%s3393_s4 + $0x3f8] sm:$0xff]  ;;  %v1046_v23 = vld [vmem:[%s3393_s4 + $0x70] sm:$0xff] }
  0x84   :  { %1172 = vmatpush.msra.mxu0 %v1939_v24  ;;  %997 = vmatmul.bf16.vlgmr.msrb.gmra.mxu1 %v2477_v27  ;;  %v1970_v27 = vld [vmem:[%s3393_s4 + $0x370] sm:$0xff]  ;;  %v1973_v24 = vld [vmem:[%s3393_s4 + $0x388] sm:$0xff] }
  0x85   :  { %1192 = vmatpush.msra.mxu1 %v1955_v25  ;;  %1010 = vmatmul.bf16.vlgmr.msrb.gmra.mxu2 %v2465_v19  ;;  %v1936_v19 = vld [vmem:[%s3393_s4 + $0x260] sm:$0xff]  ;;  %v1062_v25 = vld [vmem:[%s3393_s4 + $0xf0] sm:$0xff] }
  0x86   :  { %1023 = vmatmul.bf16.vlgmr.msrb.gmra.mxu3 %v2475_v26  ;;  %1173 = vmatpush.msra.mxu0 %v1938_v28  ;;  %v1952_v26 = vld [vmem:[%s3393_s4 + $0x2e0] sm:$0xff] }
  0x87   :  { %1193 = vmatpush.msra.mxu1 %v1954_v29  ;;  %1212 = vmatpush.msra.mxu2 %v1971_v30  ;;  %v1956_v28 = vld [vmem:[%s3393_s4 + $0x300] sm:$0xff]  ;;  %v1045_v29 = vld [vmem:[%s3393_s4 + $0x68] sm:$0xff]  ;;  %v1166_v30 = vld.sshfl [vmem:[#allocation1 + $0x10] sm:$0xff pattern:$0x73625140] }
  0x88   :  { %1174 = vmatpush.msra.mxu0 %v1937_v31  ;;  %1232 = vmatpush.msra.mxu3 %v1987_v20  ;;  %v1061_v31 = vld [vmem:[%s3393_s4 + $0xe8] sm:$0xff]  ;;  %v1044_v20 = vld [vmem:[%s3393_s4 + $0x60] sm:$0xff] }
  0x89   :  { %1194 = vmatpush.msra.mxu1 %v1953_v32  ;;  %1213 = vmatpush.msra.mxu2 %v1970_v27  ;;  %v1060_v32 = vld [vmem:[%s3393_s4 + $0xe0] sm:$0xff]  ;;  %v1043_v27 = vld [vmem:[%s3393_s4 + $0x58] sm:$0xff] }
  0x8a   :  { %1175 = vmatpush.msra.mxu0 %v1936_v19  ;;  %1233 = vmatpush.msra.mxu3 %v1986_v33  ;;  %v1059_v19 = vld [vmem:[%s3393_s4 + $0xd8] sm:$0xff]  ;;  %v1972_v33 = vld [vmem:[%s3393_s4 + $0x380] sm:$0xff] }
  0x8b   :  { %1195 = vmatpush.msra.mxu1 %v1952_v26  ;;  %1214 = vmatpush.msra.mxu2 %v1969_v34  ;;  %v1164_v26 = vld.sshfl [vmem:[#allocation1] sm:$0xff pattern:$0x73625140]  ;;  %v1167_v34 = vld.sshfl [vmem:[#allocation1 + $0x18] sm:$0xff pattern:$0x73625140] }
  0x8c   :  { %1176 = vmatpush.msra.mxu0 %v1935_v35  ;;  %1234 = vmatpush.msra.mxu3 %v1985_v36  ;;  %v1042_v35 = vld [vmem:[%s3393_s4 + $0x50] sm:$0xff]  ;;  %v1165_v36 = vld.sshfl [vmem:[#allocation1 + $0x8] sm:$0xff pattern:$0x73625140] }
  0x8d   :  { %1196 = vmatpush.msra.mxu1 %v1951_v37  ;;  %1215 = vmatpush.msra.mxu2 %v1968_v38  ;;  %v3194_v37 = vld [vmem:[%s3394_s7] sm:$0xff]  ;;  %v1058_v38 = vld [vmem:[%s3393_s4 + $0xd0] sm:$0xff] }
  0x8e   :  { %1177 = vmatpush.msra.mxu0 %v1934_v39  ;;  %1235 = vmatpush.msra.mxu3 %v1984_v40  ;;  %v1041_v39 = vld [vmem:[%s3393_s4 + $0x48] sm:$0xff] }
  0x8f   :  { %1197 = vmatpush.msra.mxu1 %v1950_v41  ;;  %1216 = vmatpush.msra.mxu2 %v1967_v42  ;;  %v1057_v40 = vld [vmem:[%s3393_s4 + $0xc8] sm:$0xff]  ;;  %v176_v41 = vperm.slane %v3194_v37, 0  ;;  %v1040_v42 = vld [vmem:[%s3393_s4 + $0x40] sm:$0xff] }
  0x90   :  { %1178 = vmatpush.msra.mxu0 %v1933_v43  ;;  %1236 = vmatpush.msra.mxu3 %v1983_v44  ;;  %v1056_v43 = vld [vmem:[%s3393_s4 + $0xc0] sm:$0xff]  ;;  %v1039_v44 = vld [vmem:[%s3393_s4 + $0x38] sm:$0xff] }
  0x91   :  { %1198 = vmatpush.msra.mxu1 %v1949_v45  ;;  %1217 = vmatpush.msra.mxu2 %v1966_v46  ;;  %v1055_v46 = vld [vmem:[%s3393_s4 + $0xb8] sm:$0xff] }
  0x92   :  { %1179 = vmatpush.msra.mxu0 %v1932_v47  ;;  %1237 = vmatpush.msra.mxu3 %v1982_v48  ;;  %v1079_v47 = vld [vmem:[%s3393_s4 + $0x178] sm:$0xff] }
  0x93   :  { %1199 = vmatpush.msra.mxu1 %v1948_v49  ;;  %1218 = vmatpush.msra.mxu2 %v1965_v50  ;;  %v1038_v50 = vld [vmem:[%s3393_s4 + $0x30] sm:$0xff] }
  0x94   :  { %1180 = vmatpush.msra.mxu0 %v1931_v51  ;;  %1238 = vmatpush.msra.mxu3 %v1981_v52  ;;  %v1054_v51 = vld [vmem:[%s3393_s4 + $0xb0] sm:$0xff] }
  0x95   :  { %1200 = vmatpush.msra.mxu1 %v1947_v53  ;;  %1219 = vmatpush.msra.mxu2 %v1964_v54  ;;  %v1078_v52 = vld [vmem:[%s3393_s4 + $0x170] sm:$0xff]  ;;  %v1077_v53 = vld [vmem:[%s3393_s4 + $0x168] sm:$0xff] }
  0x96   :  { %1181 = vmatpush.msra.mxu0 %v1930_v55  ;;  %1239 = vmatpush.msra.mxu3 %v1980_v56  ;;  %v1037_v55 = vld [vmem:[%s3393_s4 + $0x28] sm:$0xff] }
  0x97   :  { %1201 = vmatpush.msra.mxu1 %v1946_v57  ;;  %1220 = vmatpush.msra.mxu2 %v1963_v58  ;;  %v1053_v56 = vld [vmem:[%s3393_s4 + $0xa8] sm:$0xff]  ;;  %v1076_v57 = vld [vmem:[%s3393_s4 + $0x160] sm:$0xff] }
  0x98   :  { %1182 = vmatpush.msra.mxu0 %v1929_v59  ;;  %1240 = vmatpush.msra.mxu3 %v1979_v60  ;;  %v1036_v59 = vld [vmem:[%s3393_s4 + $0x20] sm:$0xff] }
  0x99   :  { %1202 = vmatpush.msra.mxu1 %v1945_v61  ;;  %1221 = vmatpush.msra.mxu2 %v1962_v62  ;;  %v1052_v62 = vld [vmem:[%s3393_s4 + $0xa0] sm:$0xff] }
  0x9a   :  { %1183 = vmatpush.msra.mxu0 %v1928_v63  ;;  %1241 = vmatpush.msra.mxu3 %v1978_v0  ;;  %v1075_v63 = vld [vmem:[%s3393_s4 + $0x158] sm:$0xff] }
  0x9b   :  { %1203 = vmatpush.msra.mxu1 %v1944_v1  ;;  %1222 = vmatpush.msra.mxu2 %v1961_v2  ;;  %v1035_v0 = vld [vmem:[%s3393_s4 + $0x18] sm:$0xff] }
  0x9c   :  { %1184 = vmatpush.msra.mxu0 %v1927_v3  ;;  %1242 = vmatpush.msra.mxu3 %v1977_v7  ;;  %v1051_v2 = vld [vmem:[%s3393_s4 + $0x98] sm:$0xff]  ;;  %v1074_v3 = vld [vmem:[%s3393_s4 + $0x150] sm:$0xff] }
  0x9d   :  { %1204 = vmatpush.msra.mxu1 %v1943_v4  ;;  %1223 = vmatpush.msra.mxu2 %v1960_v6  ;;  %v1034_v6 = vld [vmem:[%s3393_s4 + $0x10] sm:$0xff] }
  0x9e   :  { %1185 = vmatpush.msra.mxu0 %v1926_v5  ;;  %1243 = vmatpush.msra.mxu3 %v1976_v10  ;;  %v1050_v7 = vld [vmem:[%s3393_s4 + $0x90] sm:$0xff]  ;;  %v1049_v10 = vld [vmem:[%s3393_s4 + $0x88] sm:$0xff] }
  0x9f   :  { %1205 = vmatpush.msra.mxu1 %v1942_v8  ;;  %1224 = vmatpush.msra.mxu2 %v1959_v9  ;;  %v1073_v8 = vld [vmem:[%s3393_s4 + $0x148] sm:$0xff] }
  0xa0   :  { %1186 = vmatpush.msra.mxu0 %v1925_v11  ;;  %1244 = vmatpush.msra.mxu3 %v1975_v14  ;;  %v1033_v9 = vld [vmem:[%s3393_s4 + $0x8] sm:$0xff]  ;;  %v1072_v11 = vld [vmem:[%s3393_s4 + $0x140] sm:$0xff] }
  0xa1   :  { %1206 = vmatpush.msra.mxu1 %v1941_v12  ;;  %1225 = vmatpush.msra.mxu2 %v1958_v13  ;;  %v1032_v14 = vld [vmem:[%s3393_s4] sm:$0xff] }
  0xa2   :  { %1187 = vmatpush.msra.mxu0 %v1924_v15  ;;  %1245 = vmatpush.msra.mxu3 %v1974_v16  ;;  %v1048_v16 = vld [vmem:[%s3393_s4 + $0x80] sm:$0xff] }
  0xa3   :  { %1207 = vmatpush.msra.mxu1 %v1940_v18  ;;  %1226 = vmatpush.msra.mxu2 %v1957_v22  ;;  %v30_v18 = vld [vmem:[%s3394_s7 + $0x8] sm:$0xff] }
  0xa4   :  { %1252 = vmatpush.msrb.mxu0 %v1047_v17  ;;  %1246 = vmatpush.msra.mxu3 %v1973_v24  ;;  %v1071_v17 = vld [vmem:[%s3393_s4 + $0x138] sm:$0xff]  ;;  %v177_v22 = vperm.slane %v30_v18, 0 }
  0xa5   :  { %1272 = vmatpush.msrb.mxu1 %v1063_v21  ;;  %1227 = vmatpush.msra.mxu2 %v1956_v28  ;;  %v1070_v21 = vld [vmem:[%s3393_s4 + $0x130] sm:$0xff] }
  0xa6   :  { %1253 = vmatpush.msrb.mxu0 %v1046_v23  ;;  %1228 = vmatmul.f32.vlgmr.msra.gmra.mxu2 %v1166_v30  ;;  %v1069_v23 = vld [vmem:[%s3393_s4 + $0x128] sm:$0xff] }
  0xa7   :  { %1273 = vmatpush.msrb.mxu1 %v1062_v25  ;;  %1247 = vmatpush.msra.mxu3 %v1972_v33 }
  0xa8   :  { %1254 = vmatpush.msrb.mxu0 %v1045_v29  ;;  %1248 = vmatmul.f32.vlgmr.msra.gmra.mxu3 %v1167_v34  ;;  %v1068_v29 = vld [vmem:[%s3393_s4 + $0x120] sm:$0xff]  ;;  %v1065_v34 = vld [vmem:[%s3393_s4 + $0x108] sm:$0xff] }
  0xa9   :  { %1274 = vmatpush.msrb.mxu1 %v1061_v31  ;;  %1188 = vmatmul.f32.vlgmr.msra.gmra.mxu0 %v1164_v26  ;;  %v1067_v31 = vld [vmem:[%s3393_s4 + $0x118] sm:$0xff] }
  0xaa   :  { %1255 = vmatpush.msrb.mxu0 %v1044_v20  ;;  %1208 = vmatmul.f32.vlgmr.msra.gmra.mxu1 %v1165_v36  ;;  %v829_v45 = vpop.f32.mrf.mxu0  ;;  %v1064_v36 = vld [vmem:[%s3393_s4 + $0x100] sm:$0xff] }
  0xab   :  { %1275 = vmatpush.msrb.mxu1 %v1060_v32  ;;  %v830_v48 = vadd.f32 %v829_v45, %v176_v41  ;;  %1292 = vmatpush.msrb.mxu2 %v1079_v47  ;;  %v1093_v41 = vld [vmem:[%s3393_s4 + $0x1e8] sm:$0xff]  ;;  %v1091_v45 = vld [vmem:[%s3393_s4 + $0x1d8] sm:$0xff] }
  0xac   :  { %1256 = vmatpush.msrb.mxu0 %v1043_v27  ;;  %v842_v49 = vpop.f32.mrf.mxu1  ;;  %v1089_v47 = vld [vmem:[%s3393_s4 + $0x1c8] sm:$0xff] }
  0xad   :  { %1276 = vmatpush.msrb.mxu1 %v1059_v19  ;;  %v843_v54 = vadd.f32 %v842_v49, %v830_v48  ;;  %1293 = vmatpush.msrb.mxu2 %v1078_v52  ;;  %v1066_v19 = vld [vmem:[%s3393_s4 + $0x110] sm:$0xff]  ;;  %v1088_v48 = vld [vmem:[%s3393_s4 + $0x1c0] sm:$0xff]  ;;  %v1087_v49 = vld [vmem:[%s3393_s4 + $0x1b8] sm:$0xff] }
  0xae   :  { %1257 = vmatpush.msrb.mxu0 %v1042_v35  ;;  %v1095_v35 = vld [vmem:[%s3393_s4 + $0x1f8] sm:$0xff]  ;;  %v1086_v52 = vld [vmem:[%s3393_s4 + $0x1b0] sm:$0xff] }
  0xaf   :  { %1277 = vmatpush.msrb.mxu1 %v1058_v38  ;;  %v855_v58 = vpop.f32.mrf.mxu2  ;;  %1294 = vmatpush.msrb.mxu2 %v1077_v53  ;;  %v1085_v53 = vld [vmem:[%s3393_s4 + $0x1a8] sm:$0xff] }
  0xb0   :  { %1258 = vmatpush.msrb.mxu0 %v1041_v39  ;;  %v856_v60 = vadd.f32 %v855_v58, %v843_v54  ;;  %1312 = vmatpush.msrb.mxu3 %v1095_v35  ;;  %v1084_v54 = vld [vmem:[%s3393_s4 + $0x1a0] sm:$0xff] }
  0xb1   :  { %1278 = vmatpush.msrb.mxu1 %v1057_v40  ;;  %v868_v61 = vpop.f32.mrf.mxu3  ;;  %1295 = vmatpush.msrb.mxu2 %v1076_v57  ;;  %v1094_v40 = vld [vmem:[%s3393_s4 + $0x1f0] sm:$0xff] }
  0xb2   :  { %1259 = vmatpush.msrb.mxu0 %v1040_v42  ;;  %v831_v1 = vpop.f32.mrf.mxu0  ;;  %v869_v4 = vadd.f32 %v868_v61, %v856_v60  ;;  %1313 = vmatpush.msrb.mxu3 %v1094_v40  ;;  %v1092_v42 = vld [vmem:[%s3393_s4 + $0x1e0] sm:$0xff]  ;;  %v1082_v61 = vld [vmem:[%s3393_s4 + $0x190] sm:$0xff]  ;;  %v1332_v40 = vperm.slane %v3194_v37, 1 }
  0xb3   :  { %1279 = vmatpush.msrb.mxu1 %v1056_v43  ;;  %1296 = vmatpush.msrb.mxu2 %v1075_v63 }
  0xb4   :  { %1260 = vmatpush.msrb.mxu0 %v1039_v44  ;;  %v844_v5 = vpop.f32.mrf.mxu1  ;;  %v1028_v12 = vmax.f32 %v869_v4, 0.0  ;;  %1314 = vmatpush.msrb.mxu3 %v1093_v41 }
  0xb5   :  { %1280 = vmatpush.msrb.mxu1 %v1055_v46  ;;  %1297 = vmatpush.msrb.mxu2 %v1074_v3  ;;  %v1090_v46 = vld [vmem:[%s3393_s4 + $0x1d0] sm:$0xff]  ;;  %v1080_v3 = vld [vmem:[%s3393_s4 + $0x180] sm:$0xff] }
  0xb6   :  { %1261 = vmatpush.msrb.mxu0 %v1038_v50  ;;  %1315 = vmatpush.msrb.mxu3 %v1092_v42  ;;  %v31_v50 = vld [vmem:[%s3394_s7 + $0x10] sm:$0xff] }
  0xb7   :  { %1281 = vmatpush.msrb.mxu1 %v1054_v51  ;;  %v857_v13 = vpop.f32.mrf.mxu2  ;;  %1298 = vmatpush.msrb.mxu2 %v1073_v8  ;;  %v178_v51 = vperm.slane %v31_v50, 0  ;;  %v32_v8 = vld [vmem:[%s3394_s7 + $0x18] sm:$0xff] }
  0xb8   :  { %1262 = vmatpush.msrb.mxu0 %v1037_v55  ;;  %1316 = vmatpush.msrb.mxu3 %v1091_v45  ;;  %v1367_v45 = vld [vmem:[%s3396_s6 + $0x8] sm:$0xff] }
  0xb9   :  { %1282 = vmatpush.msrb.mxu1 %v1053_v56  ;;  %v870_v15 = vpop.f32.mrf.mxu3  ;;  %1299 = vmatpush.msrb.mxu2 %v1072_v11 }
  0xba   :  { %1263 = vmatpush.msrb.mxu0 %v1036_v59  ;;  %1317 = vmatpush.msrb.mxu3 %v1090_v46  ;;  %v1083_v59 = vld [vmem:[%s3393_s4 + $0x198] sm:$0xff]  ;;  %v1366_v46 = vld [vmem:[%s3396_s6] sm:$0xff] }
  0xbb   :  { %1283 = vmatpush.msrb.mxu1 %v1052_v62  ;;  %1300 = vmatpush.msrb.mxu2 %v1071_v17 }
  0xbc   :  { %1264 = vmatpush.msrb.mxu0 %v1035_v0  ;;  %1318 = vmatpush.msrb.mxu3 %v1089_v47  ;;  %v1081_v0 = vld [vmem:[%s3393_s4 + $0x188] sm:$0xff]  ;;  %v1363_v47 = vld [vmem:[%s3397_s2] sm:$0x3] }
  0xbd   :  { %1284 = vmatpush.msrb.mxu1 %v1051_v2  ;;  %1301 = vmatpush.msrb.mxu2 %v1070_v21 }
  0xbe   :  { %1265 = vmatpush.msrb.mxu0 %v1034_v6  ;;  %1319 = vmatpush.msrb.mxu3 %v1088_v48  ;;  %v2122_v48 = vmov 0  }
  0xbf   :  { %1285 = vmatpush.msrb.mxu1 %v1050_v7  ;;  %1302 = vmatpush.msrb.mxu2 %v1069_v23 }
  0xc0   :  { %1266 = vmatpush.msrb.mxu0 %v1033_v9  ;;  %v881_v24 = vpop.f32.mrf.mxu0  ;;  %1320 = vmatpush.msrb.mxu3 %v1087_v49  ;;  %v179_v9 = vperm.slane %v32_v8, 0  ;;  %v1364_v49 = vmul.f32 0.015625, %v1363_v47 }
  0xc1   :  { %1286 = vmatpush.msrb.mxu1 %v1049_v10  ;;  %v882_v25 = vadd.f32 %v881_v24, %v177_v22  ;;  %v894_v28 = vpop.f32.mrf.mxu1  ;;  %1303 = vmatpush.msrb.mxu2 %v1068_v29  ;;  %v1368_v29 = vld [vmem:[%s3396_s6 + $0x10] sm:$0x3] }
  0xc2   :  { %1267 = vmatpush.msrb.mxu0 %v1032_v14  ;;  %1321 = vmatpush.msrb.mxu3 %v1086_v52  ;;  %v1989_v50 = vadd.f32 -0.5, %v1364_v49 }
  0xc3   :  { %1268 = vmatmul.f32.vlgmr.msrb.gmra.mxu0 %v1028_v12  ;;  %1287 = vmatpush.msrb.mxu1 %v1048_v16  ;;  %v895_v30 = vadd.f32 %v894_v28, %v882_v25  ;;  %v1336_v25 = vld [vmem:[%s3395_s5 + $0x8] sm:$0xff]  ;;  %v1335_v28 = vld [vmem:[%s3395_s5] sm:$0xff] }
  0xc4   :  { %1304 = vmatpush.msrb.mxu2 %v1067_v31  ;;  %1322 = vmatpush.msrb.mxu3 %v1085_v53 }
  0xc5   :  { %1356 = vmatpush.msra.mxu0 %v1336_v25  ;;  %1990 = vmatpush.msk.msra.mxu1 %vm1380_vm0, %v1368_v29 }
  0xc6   :  { %1305 = vmatpush.msrb.mxu2 %v1066_v19  ;;  %1323 = vmatpush.msrb.mxu3 %v1084_v54 }
  0xc7   :  { %1357 = vmatpush.msra.mxu0 %v1335_v28  ;;  %1398 = vmatpush.msra.mxu1 %v1367_v45 }
  0xc8   :  { %v907_v20 = vpop.f32.mrf.mxu2  ;;  %v883_v26 = vpop.f32.mrf.mxu0  ;;  %1306 = vmatpush.msrb.mxu2 %v1065_v34  ;;  %1324 = vmatpush.msrb.mxu3 %v1083_v59 }
  0xc9   :  { %v908_v32 = vadd.f32 %v907_v20, %v895_v30  ;;  %v920_v27 = vpop.f32.mrf.mxu3  ;;  %v896_v38 = vpop.f32.mrf.mxu1  ;;  %1399 = vmatpush.msra.mxu1 %v1366_v46  ;;  %2121 = vset.pattern.permute.xlu0 %v2122_v48 }
  0xca   :  { %1307 = vmatpush.msrb.mxu2 %v1064_v36  ;;  %1325 = vmatpush.msrb.mxu3 %v1082_v61 }
  0xcb   :  { %v921_v33 = vadd.f32 %v920_v27, %v908_v32  ;;  %1371 = vperm.xlu0 %2121, %v1989_v50  }
  0xcc   :  { %1326 = vmatpush.msrb.mxu3 %v1081_v0 }
  0xcd   :  { %v1029_v39 = vmax.f32 %v921_v33, 0.0 }
  0xce   :  { %1327 = vmatpush.msrb.mxu3 %v1080_v3 }
  0xcf   :  { %1288 = vmatmul.f32.vlgmr.msrb.gmra.mxu1 %v1029_v39 }
  0xd0   :  { %v909_v43 = vpop.f32.mrf.mxu2 }
  0xd1   :  { %v922_v44 = vpop.f32.mrf.mxu3 }
  0xe0   :  { %v933_v55 = vpop.f32.mrf.mxu0 }
  0xe1   :  { %v934_v56 = vadd.f32 %v933_v55, %v178_v51  ;;  %v946_v57 = vpop.f32.mrf.mxu1  ;;  %v1337_v51 = vperm.slane %v3194_v37, 2  ;;  %v1374_v55 = vperm.slane %v3194_v37, 3 }
  0xe3   :  { %v947_v58 = vadd.f32 %v946_v57, %v934_v56 }
  0xe8   :  { %v959_v60 = vpop.f32.mrf.mxu2  ;;  %v935_v2 = vpop.f32.mrf.mxu0 }
  0xe9   :  { %v960_v62 = vadd.f32 %v959_v60, %v947_v58  ;;  %v972_v63 = vpop.f32.mrf.mxu3  ;;  %v948_v4 = vpop.f32.mrf.mxu1  ;;  %v1404_v58 = vperm.slane %v3194_v37, 4 }
  0xeb   :  { %v973_v1 = vadd.f32 %v972_v63, %v960_v62 }
  0xed   :  { %v1030_v5 = vmax.f32 %v973_v1, 0.0 }
  0xef   :  { %1308 = vmatmul.f32.vlgmr.msrb.gmra.mxu2 %v1030_v5 }
  0xf0   :  { %v961_v6 = vpop.f32.mrf.mxu2 }
  0xf1   :  { %v974_v7 = vpop.f32.mrf.mxu3 }
 0x100   :  { %v985_v10 = vpop.f32.mrf.mxu0 }
 0x101   :  { %v986_v11 = vadd.f32 %v985_v10, %v179_v9  ;;  %v998_v12 = vpop.f32.mrf.mxu1 }
 0x103   :  { %v999_v13 = vadd.f32 %v998_v12, %v986_v11 }
 0x108   :  { %v1011_v14 = vpop.f32.mrf.mxu2  ;;  %v987_v17 = vpop.f32.mrf.mxu0 }
 0x109   :  { %v1012_v15 = vadd.f32 %v1011_v14, %v999_v13  ;;  %v1024_v16 = vpop.f32.mrf.mxu3  ;;  %v1000_v18 = vpop.f32.mrf.mxu1 }
 0x10b   :  { %v1025_v21 = vadd.f32 %v1024_v16, %v1012_v15 }
 0x10d   :  { %v1031_v22 = vmax.f32 %v1025_v21, 0.0 }
 0x10f   :  { %1328 = vmatmul.f32.vlgmr.msrb.gmra.mxu3 %v1031_v22 }
 0x110   :  { %v1013_v23 = vpop.f32.mrf.mxu2 }
 0x111   :  { %v1026_v24 = vpop.f32.mrf.mxu3 }
 0x126   :  { %v1189_v31 = vpop.f32.mrf.mxu0 }
 0x127   :  { %v1209_v30 = vpop.f32.mrf.mxu1 }
 0x128   :  { %v1210_v20 = vadd.f32 %v1209_v30, %v1189_v31 }
 0x129   :  { %v1229_v32 = vpop.f32.mrf.mxu2 }
 0x12a   :  { %v1230_v27 = vadd.f32 %v1229_v32, %v1210_v20 }
 0x12b   :  { %v1249_v19 = vpop.f32.mrf.mxu3 }
 0x12c   :  { %v1250_v33 = vadd.f32 %v1249_v19, %v1230_v27 }
 0x13d   :  { %v1372_v56 = vpop.permute.xlu0 %1371 }
 0x13e   :  { %v1375_v57 = vmul.f32 %v1374_v55, %v1372_v56 }
 0x140   :  { %v1269_v26 = vpop.f32.mrf.mxu0 }
 0x141   :  { %v1270_v34 = vadd.f32 %v1269_v26, %v1250_v33 }
 0x14c   :  { %v1289_v35 = vpop.f32.mrf.mxu1 }
 0x14d   :  { %v1290_v38 = vadd.f32 %v1289_v35, %v1270_v34 }
 0x172   :  { %v1309_v36 = vpop.f32.mrf.mxu2 }
 0x173   :  { %v1310_v39 = vadd.f32 %v1309_v36, %v1290_v38 }
 0x192   :  { %v1329_v41 = vpop.f32.mrf.mxu3 }
 0x193   :  { %v1330_v42 = vadd.f32 %v1329_v41, %v1310_v39 }
 0x195   :  { %v1333_v43 = vadd.f32 %v1332_v40, %v1330_v42 }
 0x197   :  { %v1334_v44 = vmax.f32 %v1333_v43, 0.0 }
 0x199   :  { %1988 = vmatmul.msk.f32.vlgmr.msra.gmra.mxu0 %vm1338_vm1, %v1334_v44 }
 0x216   :  { %v1359_v52 = vpop.f32.mrf.mxu0 }
 0x217   :  { %v1360_v53 = vadd.f32 %v1359_v52, %v1337_v51 }
 0x219   :  { %v1362_v54 = vmax.f32 %v1360_v53, 0.0 }
 0x21b   :  { %1991 = vmatmul.msk.f32.vlgmr.msra.gmra.mxu1 %vm1376_vm2, %v1362_v54 }
 0x298   :  { %v1401_v59 = vpop.f32.mrf.mxu1 }
 0x299   :  { %v1402_v60 = vadd.f32 %v1401_v59, %v1375_v57 }
 0x29b   :  { %v1405_v61 = vadd.f32 %v1404_v58, %v1402_v60 }
 0x29d   :  { %1407 = vst.msk [vmem:[%s3398_s8] sm:$0x3] %vm1406_vm3, %v1405_v61 }

</bundles_post_ra>
